<compile_context>
chip_gen: v5e
topology: v5e:2x2
jax: 0.10.0
libtpu: 0.0.40
codegen_flags: <defaults>
</compile_context>

<pallas_src>
import functools

import jax
import jax.numpy as jnp
from jax import lax
from jax.experimental import pallas as pl
from jax.experimental.pallas import tpu as pltpu

# ----------------------------- configuration (small, synthetic) --------------
D_MODEL = 64
N_LAYER = 2
VOCAB_RAW = 120
PAD_VOCAB_MULT = 16
VOCAB = VOCAB_RAW + (PAD_VOCAB_MULT - VOCAB_RAW % PAD_VOCAB_MULT) % PAD_VOCAB_MULT  # 128

# ssm_cfg (DiscreteMamba2)
D_STATE = 16
N_QK_HEADS = 4
N_V_HEADS = 4
D_CONV = 4
EXPAND = 1
D_INNER = EXPAND * D_MODEL
HEADDIM = D_INNER // N_V_HEADS
CONV_DIM = D_INNER + 2 * N_QK_HEADS * D_STATE          # x, B, C go through the conv (192)
D_IN_PROJ = CONV_DIM + D_INNER + N_V_HEADS             # raw [x | B | C | z | A_log] = 260
D_IN_PROJ_PAD = 384                                    # packed lane-dense width

# packed (lane-aligned) column layout of the in_proj slab
XBC_OFF = 0                                            # x|B|C : [0, 192)
Z_OFF = 256                                            # z     : [256, 320)  (tile aligned)
A_OFF = 320                                            # A_log : [320, 324)

# mlp_cfg (LlamaMLP)
INTERMEDIATE = 128

RMS_EPS = 1e-5       # Block layernorms (hardcoded 1e-05 in the module)
NORM_EPS = 1e-5      # config.norm_epsilon (final layernorm)

# TODO(synk): grouped B/C broadcast for n_v_heads != n_qk_heads not implemented.
assert N_QK_HEADS == N_V_HEADS


# ----------------------------- small math helpers (lowerable in-kernel) ------
def _softplus(x):
    return jnp.maximum(x, 0.0) + jnp.log(1.0 + jnp.exp(-jnp.abs(x)))


def _silu(x):
    return x * (1.0 / (1.0 + jnp.exp(-x)))


# ----------------------------- fused whole-stack kernel -----------------------
def _layers_kernel(h0_ref, ln1_ref, ln2_ref, win_ref, convw_ref, convb_ref,
                   dcol_ref, zbias_ref, wout_ref, wgu_ref, wdown_ref, h_ref,
                   *, nb, L, d_model, d_conv, d_inner, n_heads, d_state,
                   inter, z_off, a_off, eps):
    f32 = jnp.float32
    bf16 = jnp.bfloat16
    conv_dim = d_inner + 2 * n_heads * d_state
    headdim = d_inner // n_heads
    M = nb * L

    # hidden state is VMEM-resident across the layer grid axis; seed it once.
    @pl.when(pl.program_id(0) == 0)
    def _():
        h_ref[...] = h0_ref[...]

    resid = h_ref[...].reshape(M, d_model).astype(f32)               # (M, D)

    # ---- RMSNorm 1 (f32) ----
    var1 = jnp.mean(resid * resid, axis=-1, keepdims=True)
    x1 = resid * lax.rsqrt(var1 + eps) * ln1_ref[0].astype(f32)

    # ---- in_proj: one bf16 MXU matmul into the lane-aligned 384-wide slab ----
    zxbc = jnp.dot(x1.astype(bf16), win_ref[0],
                   preferred_element_type=f32)                       # (M, 384)

    # ---- causal depthwise conv1d over the whole slab via XLU rolls.
    #      z / A_log columns carry an identity tap so they pass through as-is.
    wconv = convw_ref[0].astype(f32)                                 # (d_conv, 384)
    acc = zxbc * wconv[d_conv - 1:d_conv, :]                         # shift-0 tap
    t_in_seq = lax.broadcasted_iota(jnp.int32, (nb, L, 1), 1).reshape(M, 1)
    for s in range(1, d_conv):
        shifted = pltpu.roll(zxbc, shift=s, axis=0)                  # row t <- row t-s
        shifted = jnp.where(t_in_seq >= s, shifted, 0.0)             # causal pad + batch boundary
        acc = acc + shifted * wconv[d_conv - 1 - s:d_conv - s, :]
    acc = acc + convb_ref[0].astype(f32)

    x = acc[:, :d_inner]                                             # (M, H*P)
    Bm = acc[:, d_inner:d_inner + n_heads * d_state]                 # (M, H*N)
    Cm = acc[:, d_inner + n_heads * d_state:conv_dim]                # (M, H*N)
    z = acc[:, z_off:z_off + d_inner]                                # (M, H*P)
    a_log = acc[:, a_off:a_off + n_heads]                            # (M, H)

    # ---- discrete Mamba2 SSD (single-chunk dual form), per sequence ----
    # TODO(synk): chunk the (L,L) decay/G tensors (carrying inter-chunk state)
    #             before scaling L past ~256 so VMEM stays bounded on v7x.
    dt = _softplus(a_log)                                            # (M, H)
    t_idx = lax.broadcasted_iota(jnp.int32, (L, L), 0)
    s_idx = lax.broadcasted_iota(jnp.int32, (L, L), 1)
    causal = (t_idx >= s_idx).astype(f32)

    y = x * dcol_ref[0].astype(f32)                                  # D-skip (per column)
    y_ssd = []
    for b in range(nb):
        sl = slice(b * L, (b + 1) * L)
        dt_b = dt[sl, :]                                             # (L, H)
        cum_b = jnp.dot(causal, dt_b, preferred_element_type=f32)    # inclusive cumsum (L, H)
        x_b, B_b, C_b = x[sl, :], Bm[sl, :], Cm[sl, :]
        heads = []
        for h in range(n_heads):
            bh = B_b[:, h * d_state:(h + 1) * d_state].astype(bf16)  # (L, N)
            ch = C_b[:, h * d_state:(h + 1) * d_state].astype(bf16)  # (L, N)
            G = lax.dot_general(ch, bh,
                                dimension_numbers=(((1,), (1,)), ((), ())),
                                preferred_element_type=f32)          # (L, L) = C @ B^T
            cumh = cum_b[:, h:h + 1]                                 # (L, 1)
            # clamp keeps exp finite even off the causal triangle; mask by mult.
            decay = jnp.exp(jnp.minimum(cumh.T - cumh, 0.0)) * causal
            xh = x_b[:, h * headdim:(h + 1) * headdim]               # static head slice (L, P)
            heads.append(jnp.dot((G * decay).astype(bf16), xh.astype(bf16),
                                 preferred_element_type=f32))        # (L, P)
        y_ssd.append(jnp.concatenate(heads, axis=-1))                # (L, d_inner)
    y = y + jnp.concatenate(y_ssd, axis=0)                           # (M, d_inner)

    # ---- SiLU(z) gate, out_proj + residual ----
    zg = z + zbias_ref[0].astype(f32)
    gated = y * _silu(zg)
    h2 = jnp.dot(gated.astype(bf16), wout_ref[0],
                 preferred_element_type=f32) + resid                 # (M, D)

    # ---- RMSNorm 2 + fused gate|up MLP + down + residual ----
    var2 = jnp.mean(h2 * h2, axis=-1, keepdims=True)
    xn = h2 * lax.rsqrt(var2 + eps) * ln2_ref[0].astype(f32)
    gu = jnp.dot(xn.astype(bf16), wgu_ref[0],
                 preferred_element_type=f32)                         # (M, 2I)
    hmlp = _silu(gu[:, :inter]) * gu[:, inter:]
    out = jnp.dot(hmlp.astype(bf16), wdown_ref[0],
                  preferred_element_type=f32) + h2

    h_ref[...] = out.reshape(nb, L, d_model).astype(h_ref.dtype)


def layers_forward(h0, params):
    B, L, D = h0.shape
    kern = functools.partial(
        _layers_kernel, nb=B, L=L, d_model=D, d_conv=D_CONV, d_inner=D_INNER,
        n_heads=N_V_HEADS, d_state=D_STATE, inter=INTERMEDIATE,
        z_off=Z_OFF, a_off=A_OFF, eps=RMS_EPS)
    return pl.pallas_call(
        kern,
        out_shape=jax.ShapeDtypeStruct((B, L, D), jnp.float32),
        grid=(N_LAYER,),
        in_specs=[
            pl.BlockSpec((B, L, D), lambda l: (0, 0, 0)),                    # embedded hidden
            pl.BlockSpec((1, 1, D), lambda l: (l, 0, 0)),                    # ln1 weight
            pl.BlockSpec((1, 1, D), lambda l: (l, 0, 0)),                    # ln2 weight
            pl.BlockSpec((1, D, D_IN_PROJ_PAD), lambda l: (l, 0, 0)),        # packed in_proj (bf16)
            pl.BlockSpec((1, D_CONV, D_IN_PROJ_PAD), lambda l: (l, 0, 0)),   # packed conv w
            pl.BlockSpec((1, 1, D_IN_PROJ_PAD), lambda l: (l, 0, 0)),        # packed conv bias
            pl.BlockSpec((1, 1, D_INNER), lambda l: (l, 0, 0)),              # D skip (per column)
            pl.BlockSpec((1, 1, D_INNER), lambda l: (l, 0, 0)),              # z bias
            pl.BlockSpec((1, D_INNER, D), lambda l: (l, 0, 0)),              # out_proj (bf16)
            pl.BlockSpec((1, D, 2 * INTERMEDIATE), lambda l: (l, 0, 0)),     # gate|up fused (bf16)
            pl.BlockSpec((1, INTERMEDIATE, D), lambda l: (l, 0, 0)),         # down_proj (bf16)
        ],
        out_specs=pl.BlockSpec((B, L, D), lambda l: (0, 0, 0)),              # resident hidden state
        compiler_params=pltpu.CompilerParams(dimension_semantics=("arbitrary",)),
    )(h0, params["ln1_w"], params["ln2_w"], params["in_proj"], params["conv_w"],
      params["conv_b"], params["D_col"], params["z_bias"], params["out_proj"],
      params["gateup"], params["down"])


# ----------------------------- fused final-norm + lm_head ---------------------
def _head_kernel(h_ref, w_ref, lm_ref, logits_ref, last_ref, xn_ref, *, eps):
    # RMSNorm is computed once (first vocab tile) into VMEM scratch and reused.
    # TODO(synk): to megacore-shard the vocab axis on v7x, move the `last`
    #             output into its own tiny call first (it relies on sequential
    #             grid execution here).
    @pl.when(pl.program_id(0) == 0)
    def _():
        x = h_ref[...].astype(jnp.float32)
        var = jnp.mean(x * x, axis=-1, keepdims=True)
        xn = x * lax.rsqrt(var + eps) * w_ref[...].astype(jnp.float32)
        xn_ref[...] = xn
        last_ref[...] = xn.astype(last_ref.dtype)

    logits_ref[...] = jnp.dot(xn_ref[...].astype(jnp.bfloat16), lm_ref[...],
                              preferred_element_type=jnp.float32)


def lm_head_forward(h_flat, ln_w, lm_w, *, tn=1024):
    M, D = h_flat.shape
    V = lm_w.shape[1]
    tn = min(tn, V)
    return pl.pallas_call(
        functools.partial(_head_kernel, eps=NORM_EPS),
        out_shape=(jax.ShapeDtypeStruct((M, V), jnp.float32),
                   jax.ShapeDtypeStruct((M, D), h_flat.dtype)),
        grid=(pl.cdiv(V, tn),),
        in_specs=[
            pl.BlockSpec((M, D), lambda j: (0, 0)),
            pl.BlockSpec((1, D), lambda j: (0, 0)),
            pl.BlockSpec((D, tn), lambda j: (0, j)),
        ],
        out_specs=(pl.BlockSpec((M, tn), lambda j: (0, j)),
                   pl.BlockSpec((M, D), lambda j: (0, 0))),
        scratch_shapes=[pltpu.VMEM((M, D), jnp.float32)],
        compiler_params=pltpu.CompilerParams(dimension_semantics=("arbitrary",)),
    )(h_flat, ln_w, lm_w)


# ----------------------------- model forward ---------------------------------
def llamba_forward(params, input_ids):
    B, L = input_ids.shape
    # embedding lookup (gather) - plain JAX glue
    h0 = jnp.take(params["embedding"], input_ids, axis=0).astype(jnp.float32)  # (B, L, D)
    h = layers_forward(h0, params)                     # ONE fused kernel for all layers
    logits, last = lm_head_forward(h.reshape(B * L, D_MODEL),
                                   params["final_ln_w"], params["lm_head"])
    return logits.reshape(B, L, VOCAB), last.reshape(B, L, D_MODEL)


# ----------------------------- deterministic params --------------------------
def init_params(key):
    k_emb, k_head, k_layers = jax.random.split(key, 3)

    def nrm(k, shape, scale=0.05):
        return scale * jax.random.normal(k, shape, jnp.float32)

    lkeys = jax.random.split(k_layers, N_LAYER)
    in_proj_l, conv_w_l, conv_b_l, out_l, gu_l, down_l = [], [], [], [], [], []
    for i in range(N_LAYER):
        lk = jax.random.split(lkeys[i], 7)
        raw_in = nrm(lk[0], (D_MODEL, D_IN_PROJ))                    # [xBC | z | A_log]
        packed = jnp.zeros((D_MODEL, D_IN_PROJ_PAD), jnp.float32)
        packed = packed.at[:, :CONV_DIM].set(raw_in[:, :CONV_DIM])
        packed = packed.at[:, Z_OFF:Z_OFF + D_INNER].set(
            raw_in[:, CONV_DIM:CONV_DIM + D_INNER])
        packed = packed.at[:, A_OFF:A_OFF + N_V_HEADS].set(
            raw_in[:, CONV_DIM + D_INNER:])
        in_proj_l.append(packed.astype(jnp.bfloat16))

        cw = nrm(lk[2], (D_CONV, CONV_DIM), 0.2)
        cb = nrm(lk[3], (1, CONV_DIM), 0.1)
        cw_p = jnp.zeros((D_CONV, D_IN_PROJ_PAD), jnp.float32)
        cw_p = cw_p.at[:, :CONV_DIM].set(cw)
        cw_p = cw_p.at[D_CONV - 1, CONV_DIM:].set(1.0)               # identity tap: passthrough
        cb_p = jnp.zeros((1, D_IN_PROJ_PAD), jnp.float32).at[:, :CONV_DIM].set(cb)
        conv_w_l.append(cw_p)
        conv_b_l.append(cb_p)

        out_l.append(nrm(lk[1], (D_INNER, D_MODEL)).astype(jnp.bfloat16))
        gate = nrm(lk[4], (D_MODEL, INTERMEDIATE))
        up = nrm(lk[5], (D_MODEL, INTERMEDIATE))
        gu_l.append(jnp.concatenate([gate, up], axis=1).astype(jnp.bfloat16))
        down_l.append(nrm(lk[6], (INTERMEDIATE, D_MODEL)).astype(jnp.bfloat16))

    d_vals = jnp.ones((N_V_HEADS,), jnp.float32)
    lm_head = nrm(k_head, (D_MODEL, VOCAB))
    lm_head = lm_head.at[:, VOCAB_RAW:].set(0.0)                     # padded-vocab cols zeroed

    return {
        "embedding": nrm(k_emb, (VOCAB, D_MODEL)),
        "final_ln_w": jnp.ones((1, D_MODEL), jnp.float32),
        "lm_head": lm_head.astype(jnp.bfloat16),
        # stacked per-layer weights (leading N_LAYER axis, selected by index_map)
        "ln1_w": jnp.ones((N_LAYER, 1, D_MODEL), jnp.float32),
        "ln2_w": jnp.ones((N_LAYER, 1, D_MODEL), jnp.float32),
        "in_proj": jnp.stack(in_proj_l),                             # (NL, D, 384) bf16
        "conv_w": jnp.stack(conv_w_l),                               # (NL, d_conv, 384)
        "conv_b": jnp.stack(conv_b_l),                               # (NL, 1, 384)
        "D_head": jnp.tile(d_vals[None], (N_LAYER, 1)),              # (NL, H) for the reference
        "D_col": jnp.tile(jnp.repeat(d_vals, HEADDIM)[None, None, :], (N_LAYER, 1, 1)),
        "z_bias": jnp.zeros((N_LAYER, 1, D_INNER), jnp.float32),
        "out_proj": jnp.stack(out_l),                                # (NL, d_inner, D) bf16
        "gateup": jnp.stack(gu_l),                                   # (NL, D, 2I) bf16
        "down": jnp.stack(down_l),                                   # (NL, I, D) bf16
    }


# ----------------------------- pure-JAX reference (recurrent form) -----------
def _bf16_mm(a, b):
    return jnp.dot(a.astype(jnp.bfloat16), b.astype(jnp.bfloat16),
                   preferred_element_type=jnp.float32)


def _ref_rmsnorm(x, w, eps):
    var = jnp.mean(x.astype(jnp.float32) ** 2, axis=-1, keepdims=True)
    return w * (x * lax.rsqrt(var + eps))


def _ref_mixer(xBC, a_log, z, params, i):
    B, L, _ = xBC.shape
    cw = params["conv_w"][i][:, :CONV_DIM]
    cb = params["conv_b"][i][0, :CONV_DIM]
    xp = jnp.pad(xBC, ((0, 0), (D_CONV - 1, 0), (0, 0)))
    conv = sum(xp[:, k:k + L, :] * cw[k][None, None, :] for k in range(D_CONV)) + cb
    x = conv[..., :D_INNER].reshape(B, L, N_V_HEADS, HEADDIM)
    Bc = conv[..., D_INNER:D_INNER + N_QK_HEADS * D_STATE].reshape(B, L, N_QK_HEADS, D_STATE)
    Cc = conv[..., D_INNER + N_QK_HEADS * D_STATE:].reshape(B, L, N_QK_HEADS, D_STATE)
    dt = jax.nn.softplus(a_log)

    def step(hstate, inp):
        xt, bt, ct, dtt = inp
        hstate = jnp.exp(-dtt)[..., None, None] * hstate + bt[..., :, None] * xt[..., None, :]
        yt = jnp.einsum("bhn,bhnp->bhp", ct, hstate)
        return hstate, yt

    h0 = jnp.zeros((B, N_V_HEADS, D_STATE, HEADDIM), jnp.float32)
    xs = (jnp.moveaxis(x, 1, 0), jnp.moveaxis(Bc, 1, 0),
          jnp.moveaxis(Cc, 1, 0), jnp.moveaxis(dt, 1, 0))
    _, ys = lax.scan(step, h0, xs)
    y = jnp.moveaxis(ys, 0, 1) + params["D_head"][i][None, None, :, None] * x
    y = y.reshape(B, L, D_INNER)
    zg = z + params["z_bias"][i][0]
    return _bf16_mm(y * (zg * jax.nn.sigmoid(zg)), params["out_proj"][i])


def ref_forward(params, ids):
    h = params["embedding"][ids].astype(jnp.float32)
    for i in range(N_LAYER):
        resid = h
        x = _ref_rmsnorm(h, params["ln1_w"][i, 0], RMS_EPS)
        full = _bf16_mm(x, params["in_proj"][i])                     # same packed slab as kernel
        xBC = full[..., :CONV_DIM]
        z = full[..., Z_OFF:Z_OFF + D_INNER]
        a_log = full[..., A_OFF:A_OFF + N_V_HEADS]
        h = _ref_mixer(xBC, a_log, z, params, i) + resid
        resid = h
        x = _ref_rmsnorm(h, params["ln2_w"][i, 0], RMS_EPS)
        gu = _bf16_mm(x, params["gateup"][i])
        g, u = gu[..., :INTERMEDIATE], gu[..., INTERMEDIATE:]
        h = resid + _bf16_mm(jax.nn.silu(g) * u, params["down"][i])
    last = _ref_rmsnorm(h, params["final_ln_w"][0], NORM_EPS)
    logits = _bf16_mm(last, params["lm_head"])
    return logits, last


# ----------------------------- main -------------------------------------------
if __name__ == "__main__":
    key = jax.random.PRNGKey(0)
    pkey, ikey = jax.random.split(key)
    params = init_params(pkey)

    B, L = 2, 8
    input_ids = jax.random.randint(ikey, (B, L), 0, VOCAB_RAW, dtype=jnp.int32)

    logits, last_hidden = jax.jit(llamba_forward)(params, input_ids)
    jax.block_until_ready(logits)

    assert logits.shape == (B, L, VOCAB) and logits.dtype == jnp.float32
    assert last_hidden.shape == (B, L, D_MODEL)

    ref_logits, ref_last = ref_forward(params, input_ids)
    assert float(jnp.max(jnp.abs(logits - ref_logits))) < 1e-2
    assert float(jnp.max(jnp.abs(last_hidden - ref_last))) < 1e-2

    print("KERNEL_OK")
</pallas_src>

<mosaic_0001>
module attributes {stable_mosaic.version = 11 : i64} {
  func.func @_head_kernel(%arg0: i32, %arg1: memref<16x64xf32, #tpu.memory_space<vmem>>, %arg2: memref<1x64xf32, #tpu.memory_space<vmem>>, %arg3: memref<64x128xbf16, #tpu.memory_space<vmem>>, %arg4: memref<16x128xf32, #tpu.memory_space<vmem>>, %arg5: memref<16x64xf32, #tpu.memory_space<vmem>>, %arg6: memref<16x64xf32, #tpu.memory_space<vmem>>) attributes {dimension_semantics = [#tpu.dimension_semantics<arbitrary>], iteration_bounds = array<i64: 1>, scalar_prefetch = 0 : i64, scratch_operands = 1 : i64, tpu.core_type = #tpu.core_type<tc>, window_params = [{pipeline_mode = #tpu.pipeline_mode<synchronous>, transform_indices = @transform_0, window_bounds = array<i64: 16, 64>}, {pipeline_mode = #tpu.pipeline_mode<synchronous>, transform_indices = @transform_1, window_bounds = array<i64: 1, 64>}, {transform_indices = @transform_2, window_bounds = array<i64: 64, 128>}, {transform_indices = @transform_3, window_bounds = array<i64: 16, 128>}, {pipeline_mode = #tpu.pipeline_mode<synchronous>, transform_indices = @transform_4, window_bounds = array<i64: 16, 64>}]} {
    %c0_i32 = arith.constant 0 : i32
    %0 = arith.cmpi eq, %arg0, %c0_i32 : i32
    %1 = arith.extui %0 : i1 to i32
    %c0_i32_0 = arith.constant 0 : i32
    %2 = arith.cmpi ne, %1, %c0_i32_0 : i32
    scf.if %2 {
      %c0_6 = arith.constant 0 : index
      %c0_7 = arith.constant 0 : index
      %8 = vector.load %arg1[%c0_6, %c0_7] : memref<16x64xf32, #tpu.memory_space<vmem>>, vector<16x64xf32>
      %9 = arith.mulf %8, %8 : vector<16x64xf32>
      %cst_8 = arith.constant dense<0.000000e+00> : vector<16xf32>
      %10 = vector.multi_reduction <add>, %9, %cst_8 [1] : vector<16x64xf32> to vector<16xf32>
      %11 = vector.shape_cast %10 : vector<16xf32> to vector<16x1xf32>
      %cst_9 = arith.constant 6.400000e+01 : f32
      %12 = vector.broadcast %cst_9 : f32 to vector<16x1xf32>
      %13 = arith.divf %11, %12 : vector<16x1xf32>
      %cst_10 = arith.constant 9.99999974E-6 : f32
      %14 = vector.broadcast %cst_10 : f32 to vector<16x1xf32>
      %15 = arith.addf %13, %14 : vector<16x1xf32>
      %16 = math.rsqrt %15 : vector<16x1xf32>
      %17 = vector.broadcast %16 : vector<16x1xf32> to vector<16x64xf32>
      %18 = arith.mulf %8, %17 : vector<16x64xf32>
      %c0_11 = arith.constant 0 : index
      %c0_12 = arith.constant 0 : index
      %19 = vector.load %arg2[%c0_11, %c0_12] : memref<1x64xf32, #tpu.memory_space<vmem>>, vector<1x64xf32>
      %20 = vector.broadcast %19 : vector<1x64xf32> to vector<16x64xf32>
      %21 = arith.mulf %18, %20 : vector<16x64xf32>
      %c0_13 = arith.constant 0 : index
      %c0_14 = arith.constant 0 : index
      %22 = vector.load %arg6[%c0_13, %c0_14] : memref<16x64xf32, #tpu.memory_space<vmem>>, vector<16x64xf32>
      tpu.vector_store %arg6[%c0_13, %c0_14], %21 {strides = array<i32>} : memref<16x64xf32, #tpu.memory_space<vmem>>, vector<16x64xf32>,
      %c0_15 = arith.constant 0 : index
      %c0_16 = arith.constant 0 : index
      %23 = vector.load %arg5[%c0_15, %c0_16] : memref<16x64xf32, #tpu.memory_space<vmem>>, vector<16x64xf32>
      tpu.vector_store %arg5[%c0_15, %c0_16], %21 {strides = array<i32>} : memref<16x64xf32, #tpu.memory_space<vmem>>, vector<16x64xf32>,
    } else {
    }
    %c0 = arith.constant 0 : index
    %c0_1 = arith.constant 0 : index
    %3 = vector.load %arg6[%c0, %c0_1] : memref<16x64xf32, #tpu.memory_space<vmem>>, vector<16x64xf32>
    %4 = arith.truncf %3 : vector<16x64xf32> to vector<16x64xbf16>
    %c0_2 = arith.constant 0 : index
    %c0_3 = arith.constant 0 : index
    %5 = vector.load %arg3[%c0_2, %c0_3] : memref<64x128xbf16, #tpu.memory_space<vmem>>, vector<64x128xbf16>
    %cst = arith.constant dense<0.000000e+00> : vector<16x128xf32>
    %6 = tpu.matmul %4, %5, %cst {dimension_numbers = #tpu.dot_dimension_numbers<[1], [0], [0], [1], [0, 0, 1, 1], [], []>} : vector<16x64xbf16>, vector<64x128xbf16>, vector<16x128xf32> -> vector<16x128xf32>
    %c0_4 = arith.constant 0 : index
    %c0_5 = arith.constant 0 : index
    %7 = vector.load %arg4[%c0_4, %c0_5] : memref<16x128xf32, #tpu.memory_space<vmem>>, vector<16x128xf32>
    tpu.vector_store %arg4[%c0_4, %c0_5], %6 {strides = array<i32>} : memref<16x128xf32, #tpu.memory_space<vmem>>, vector<16x128xf32>,
    return
  }
  func.func @transform_0(%arg0: i32) -> (i32, i32) {
    %c0_i32 = arith.constant 0 : i32
    %c0_i32_0 = arith.constant 0 : i32
    %c0_i32_1 = arith.constant 0 : i32
    return %c0_i32, %c0_i32_0 : i32, i32
  }
  func.func @transform_1(%arg0: i32) -> (i32, i32) {
    %c0_i32 = arith.constant 0 : i32
    %c0_i32_0 = arith.constant 0 : i32
    %c0_i32_1 = arith.constant 0 : i32
    return %c0_i32, %c0_i32_0 : i32, i32
  }
  func.func @transform_2(%arg0: i32) -> (i32, i32) {
    %c0_i32 = arith.constant 0 : i32
    %c0_i32_0 = arith.constant 0 : i32
    return %c0_i32, %arg0 : i32, i32
  }
  func.func @transform_3(%arg0: i32) -> (i32, i32) {
    %c0_i32 = arith.constant 0 : i32
    %c0_i32_0 = arith.constant 0 : i32
    return %c0_i32, %arg0 : i32, i32
  }
  func.func @transform_4(%arg0: i32) -> (i32, i32) {
    %c0_i32 = arith.constant 0 : i32
    %c0_i32_0 = arith.constant 0 : i32
    %c0_i32_1 = arith.constant 0 : i32
    return %c0_i32, %c0_i32_0 : i32, i32
  }
}

module attributes {stable_mosaic.version = 11 : i64} {
  func.func @_layers_kernel(%arg0: i32, %arg1: memref<2x8x64xf32, #tpu.memory_space<vmem>>, %arg2: memref<1x1x64xf32, #tpu.memory_space<vmem>>, %arg3: memref<1x1x64xf32, #tpu.memory_space<vmem>>, %arg4: memref<1x64x384xbf16, #tpu.memory_space<vmem>>, %arg5: memref<1x4x384xf32, #tpu.memory_space<vmem>>, %arg6: memref<1x1x384xf32, #tpu.memory_space<vmem>>, %arg7: memref<1x1x64xf32, #tpu.memory_space<vmem>>, %arg8: memref<1x1x64xf32, #tpu.memory_space<vmem>>, %arg9: memref<1x64x64xbf16, #tpu.memory_space<vmem>>, %arg10: memref<1x64x256xbf16, #tpu.memory_space<vmem>>, %arg11: memref<1x128x64xbf16, #tpu.memory_space<vmem>>, %arg12: memref<2x8x64xf32, #tpu.memory_space<vmem>>) attributes {dimension_semantics = [#tpu.dimension_semantics<arbitrary>], iteration_bounds = array<i64: 2>, scalar_prefetch = 0 : i64, scratch_operands = 0 : i64, tpu.core_type = #tpu.core_type<tc>, window_params = [{pipeline_mode = #tpu.pipeline_mode<synchronous>, transform_indices = @transform_0, window_bounds = array<i64: 2, 8, 64>}, {transform_indices = @transform_1, window_bounds = array<i64: 1, 1, 64>}, {transform_indices = @transform_2, window_bounds = array<i64: 1, 1, 64>}, {transform_indices = @transform_3, window_bounds = array<i64: 1, 64, 384>}, {transform_indices = @transform_4, window_bounds = array<i64: 1, 4, 384>}, {transform_indices = @transform_5, window_bounds = array<i64: 1, 1, 384>}, {transform_indices = @transform_6, window_bounds = array<i64: 1, 1, 64>}, {transform_indices = @transform_7, window_bounds = array<i64: 1, 1, 64>}, {transform_indices = @transform_8, window_bounds = array<i64: 1, 64, 64>}, {transform_indices = @transform_9, window_bounds = array<i64: 1, 64, 256>}, {transform_indices = @transform_10, window_bounds = array<i64: 1, 128, 64>}, {pipeline_mode = #tpu.pipeline_mode<synchronous>, transform_indices = @transform_11, window_bounds = array<i64: 2, 8, 64>}]} {
    %c0_i32 = arith.constant 0 : i32
    %0 = arith.cmpi eq, %arg0, %c0_i32 : i32
    %1 = arith.extui %0 : i1 to i32
    %c0_i32_0 = arith.constant 0 : i32
    %2 = arith.cmpi ne, %1, %c0_i32_0 : i32
    scf.if %2 {
      %c0_86 = arith.constant 0 : index
      %c0_87 = arith.constant 0 : index
      %c0_88 = arith.constant 0 : index
      %311 = vector.load %arg1[%c0_86, %c0_87, %c0_88] : memref<2x8x64xf32, #tpu.memory_space<vmem>>, vector<2x8x64xf32>
      %c0_89 = arith.constant 0 : index
      %c0_90 = arith.constant 0 : index
      %c0_91 = arith.constant 0 : index
      %312 = vector.load %arg12[%c0_89, %c0_90, %c0_91] : memref<2x8x64xf32, #tpu.memory_space<vmem>>, vector<2x8x64xf32>
      tpu.vector_store %arg12[%c0_89, %c0_90, %c0_91], %311 {strides = array<i32>} : memref<2x8x64xf32, #tpu.memory_space<vmem>>, vector<2x8x64xf32>,
    } else {
    }
    %c0 = arith.constant 0 : index
    %c0_1 = arith.constant 0 : index
    %c0_2 = arith.constant 0 : index
    %3 = vector.load %arg12[%c0, %c0_1, %c0_2] : memref<2x8x64xf32, #tpu.memory_space<vmem>>, vector<2x8x64xf32>
    %4 = vector.shape_cast %3 : vector<2x8x64xf32> to vector<16x64xf32>
    %5 = arith.mulf %4, %4 : vector<16x64xf32>
    %cst = arith.constant dense<0.000000e+00> : vector<16xf32>
    %6 = vector.multi_reduction <add>, %5, %cst [1] : vector<16x64xf32> to vector<16xf32>
    %7 = vector.shape_cast %6 : vector<16xf32> to vector<16x1xf32>
    %cst_3 = arith.constant 6.400000e+01 : f32
    %8 = vector.broadcast %cst_3 : f32 to vector<16x1xf32>
    %9 = arith.divf %7, %8 : vector<16x1xf32>
    %cst_4 = arith.constant 9.99999974E-6 : f32
    %10 = vector.broadcast %cst_4 : f32 to vector<16x1xf32>
    %11 = arith.addf %9, %10 : vector<16x1xf32>
    %12 = math.rsqrt %11 : vector<16x1xf32>
    %13 = vector.broadcast %12 : vector<16x1xf32> to vector<16x64xf32>
    %14 = arith.mulf %4, %13 : vector<16x64xf32>
    %c0_5 = arith.constant 0 : index
    %c0_6 = arith.constant 0 : index
    %c0_7 = arith.constant 0 : index
    %15 = vector.load %arg2[%c0_5, %c0_6, %c0_7] : memref<1x1x64xf32, #tpu.memory_space<vmem>>, vector<1x1x64xf32>
    %16 = vector.shape_cast %15 : vector<1x1x64xf32> to vector<1x64xf32>
    %17 = vector.broadcast %16 : vector<1x64xf32> to vector<16x64xf32>
    %18 = arith.mulf %14, %17 : vector<16x64xf32>
    %19 = arith.truncf %18 : vector<16x64xf32> to vector<16x64xbf16>
    %c0_8 = arith.constant 0 : index
    %c0_9 = arith.constant 0 : index
    %c0_10 = arith.constant 0 : index
    %20 = vector.load %arg4[%c0_8, %c0_9, %c0_10] : memref<1x64x384xbf16, #tpu.memory_space<vmem>>, vector<1x64x384xbf16>
    %21 = vector.shape_cast %20 : vector<1x64x384xbf16> to vector<64x384xbf16>
    %cst_11 = arith.constant dense<0.000000e+00> : vector<16x384xf32>
    %22 = tpu.matmul %19, %21, %cst_11 {dimension_numbers = #tpu.dot_dimension_numbers<[1], [0], [0], [1], [0, 0, 1, 1], [], []>} : vector<16x64xbf16>, vector<64x384xbf16>, vector<16x384xf32> -> vector<16x384xf32>
    %c0_12 = arith.constant 0 : index
    %c0_13 = arith.constant 0 : index
    %c0_14 = arith.constant 0 : index
    %23 = vector.load %arg5[%c0_12, %c0_13, %c0_14] : memref<1x4x384xf32, #tpu.memory_space<vmem>>, vector<1x4x384xf32>
    %24 = vector.shape_cast %23 : vector<1x4x384xf32> to vector<4x384xf32>
    %25 = vector.extract_strided_slice %24 {offsets = [3, 0], sizes = [1, 384], strides = [1, 1]} : vector<4x384xf32> to vector<1x384xf32>
    %26 = vector.broadcast %25 : vector<1x384xf32> to vector<16x384xf32>
    %27 = arith.mulf %22, %26 : vector<16x384xf32>
    %28 = tpu.iota {dimensions = array<i32: 1>} : vector<2x8x1xi32>
    %29 = vector.shape_cast %28 : vector<2x8x1xi32> to vector<16x1xi32>
    %c1_i32 = arith.constant 1 : i32
    %30 = tpu.dynamic_rotate %22 by %c1_i32 dim 0 : vector<16x384xf32>, i32 -> vector<16x384xf32>
    %c1_i32_15 = arith.constant 1 : i32
    %31 = vector.broadcast %c1_i32_15 : i32 to vector<16x1xi32>
    %32 = arith.cmpi sge, %29, %31 : vector<16x1xi32>
    %cst_16 = arith.constant 0.000000e+00 : f32
    %33 = vector.shape_cast %32 : vector<16x1xi1> to vector<16x1xi1>
    %34 = vector.broadcast %33 : vector<16x1xi1> to vector<16x384xi1>
    %35 = vector.broadcast %cst_16 : f32 to vector<16x384xf32>
    %36 = arith.select %34, %30, %35 : vector<16x384xi1>, vector<16x384xf32>
    %37 = vector.extract_strided_slice %24 {offsets = [2, 0], sizes = [1, 384], strides = [1, 1]} : vector<4x384xf32> to vector<1x384xf32>
    %38 = vector.broadcast %37 : vector<1x384xf32> to vector<16x384xf32>
    %39 = arith.mulf %36, %38 : vector<16x384xf32>
    %40 = arith.addf %27, %39 : vector<16x384xf32>
    %c2_i32 = arith.constant 2 : i32
    %41 = tpu.dynamic_rotate %22 by %c2_i32 dim 0 : vector<16x384xf32>, i32 -> vector<16x384xf32>
    %c2_i32_17 = arith.constant 2 : i32
    %42 = vector.broadcast %c2_i32_17 : i32 to vector<16x1xi32>
    %43 = arith.cmpi sge, %29, %42 : vector<16x1xi32>
    %cst_18 = arith.constant 0.000000e+00 : f32
    %44 = vector.shape_cast %43 : vector<16x1xi1> to vector<16x1xi1>
    %45 = vector.broadcast %44 : vector<16x1xi1> to vector<16x384xi1>
    %46 = vector.broadcast %cst_18 : f32 to vector<16x384xf32>
    %47 = arith.select %45, %41, %46 : vector<16x384xi1>, vector<16x384xf32>
    %48 = vector.extract_strided_slice %24 {offsets = [1, 0], sizes = [1, 384], strides = [1, 1]} : vector<4x384xf32> to vector<1x384xf32>
    %49 = vector.broadcast %48 : vector<1x384xf32> to vector<16x384xf32>
    %50 = arith.mulf %47, %49 : vector<16x384xf32>
    %51 = arith.addf %40, %50 : vector<16x384xf32>
    %c3_i32 = arith.constant 3 : i32
    %52 = tpu.dynamic_rotate %22 by %c3_i32 dim 0 : vector<16x384xf32>, i32 -> vector<16x384xf32>
    %c3_i32_19 = arith.constant 3 : i32
    %53 = vector.broadcast %c3_i32_19 : i32 to vector<16x1xi32>
    %54 = arith.cmpi sge, %29, %53 : vector<16x1xi32>
    %cst_20 = arith.constant 0.000000e+00 : f32
    %55 = vector.shape_cast %54 : vector<16x1xi1> to vector<16x1xi1>
    %56 = vector.broadcast %55 : vector<16x1xi1> to vector<16x384xi1>
    %57 = vector.broadcast %cst_20 : f32 to vector<16x384xf32>
    %58 = arith.select %56, %52, %57 : vector<16x384xi1>, vector<16x384xf32>
    %59 = vector.extract_strided_slice %24 {offsets = [0, 0], sizes = [1, 384], strides = [1, 1]} : vector<4x384xf32> to vector<1x384xf32>
    %60 = vector.broadcast %59 : vector<1x384xf32> to vector<16x384xf32>
    %61 = arith.mulf %58, %60 : vector<16x384xf32>
    %62 = arith.addf %51, %61 : vector<16x384xf32>
    %c0_21 = arith.constant 0 : index
    %c0_22 = arith.constant 0 : index
    %c0_23 = arith.constant 0 : index
    %63 = vector.load %arg6[%c0_21, %c0_22, %c0_23] : memref<1x1x384xf32, #tpu.memory_space<vmem>>, vector<1x1x384xf32>
    %64 = vector.shape_cast %63 : vector<1x1x384xf32> to vector<1x384xf32>
    %65 = vector.broadcast %64 : vector<1x384xf32> to vector<16x384xf32>
    %66 = arith.addf %62, %65 : vector<16x384xf32>
    %67 = vector.extract_strided_slice %66 {offsets = [0, 0], sizes = [16, 64], strides = [1, 1]} : vector<16x384xf32> to vector<16x64xf32>
    %68 = vector.extract_strided_slice %66 {offsets = [0, 64], sizes = [16, 64], strides = [1, 1]} : vector<16x384xf32> to vector<16x64xf32>
    %69 = vector.extract_strided_slice %66 {offsets = [0, 128], sizes = [16, 64], strides = [1, 1]} : vector<16x384xf32> to vector<16x64xf32>
    %70 = vector.extract_strided_slice %66 {offsets = [0, 256], sizes = [16, 64], strides = [1, 1]} : vector<16x384xf32> to vector<16x64xf32>
    %71 = vector.extract_strided_slice %66 {offsets = [0, 320], sizes = [16, 4], strides = [1, 1]} : vector<16x384xf32> to vector<16x4xf32>
    %cst_24 = arith.constant 0.000000e+00 : f32
    %72 = vector.broadcast %cst_24 : f32 to vector<16x4xf32>
    %73 = arith.maximumf %71, %72 : vector<16x4xf32>
    %74 = math.absf %71 : vector<16x4xf32>
    %cst_25 = arith.constant 0.000000e+00 : f32
    %75 = vector.broadcast %cst_25 : f32 to vector<16x4xf32>
    %76 = arith.subf %75, %74 : vector<16x4xf32>
    %77 = math.exp %76 : vector<16x4xf32>
    %cst_26 = arith.constant 1.000000e+00 : f32
    %78 = vector.broadcast %cst_26 : f32 to vector<16x4xf32>
    %79 = arith.addf %78, %77 : vector<16x4xf32>
    %80 = math.log %79 : vector<16x4xf32>
    %81 = arith.addf %73, %80 : vector<16x4xf32>
    %82 = tpu.iota {dimensions = array<i32: 0>} : vector<8x8xi32>
    %83 = tpu.iota {dimensions = array<i32: 1>} : vector<8x8xi32>
    %84 = arith.cmpi sge, %82, %83 : vector<8x8xi32>
    %85 = arith.extui %84 : vector<8x8xi1> to vector<8x8xi32>
    %86 = arith.sitofp %85 : vector<8x8xi32> to vector<8x8xf32>
    %c0_27 = arith.constant 0 : index
    %c0_28 = arith.constant 0 : index
    %c0_29 = arith.constant 0 : index
    %87 = vector.load %arg7[%c0_27, %c0_28, %c0_29] : memref<1x1x64xf32, #tpu.memory_space<vmem>>, vector<1x1x64xf32>
    %88 = vector.shape_cast %87 : vector<1x1x64xf32> to vector<1x64xf32>
    %89 = vector.broadcast %88 : vector<1x64xf32> to vector<16x64xf32>
    %90 = arith.mulf %67, %89 : vector<16x64xf32>
    %91 = vector.extract_strided_slice %81 {offsets = [0, 0], sizes = [8, 4], strides = [1, 1]} : vector<16x4xf32> to vector<8x4xf32>
    %cst_30 = arith.constant dense<0.000000e+00> : vector<8x4xf32>
    %92 = tpu.matmul %86, %91, %cst_30 {dimension_numbers = #tpu.dot_dimension_numbers<[1], [0], [0], [1], [0, 0, 1, 1], [], []>} : vector<8x8xf32>, vector<8x4xf32>, vector<8x4xf32> -> vector<8x4xf32>
    %93 = vector.extract_strided_slice %67 {offsets = [0, 0], sizes = [8, 64], strides = [1, 1]} : vector<16x64xf32> to vector<8x64xf32>
    %94 = vector.extract_strided_slice %68 {offsets = [0, 0], sizes = [8, 64], strides = [1, 1]} : vector<16x64xf32> to vector<8x64xf32>
    %95 = vector.extract_strided_slice %69 {offsets = [0, 0], sizes = [8, 64], strides = [1, 1]} : vector<16x64xf32> to vector<8x64xf32>
    %96 = vector.extract_strided_slice %94 {offsets = [0, 0], sizes = [8, 16], strides = [1, 1]} : vector<8x64xf32> to vector<8x16xf32>
    %97 = arith.truncf %96 : vector<8x16xf32> to vector<8x16xbf16>
    %98 = vector.extract_strided_slice %95 {offsets = [0, 0], sizes = [8, 16], strides = [1, 1]} : vector<8x64xf32> to vector<8x16xf32>
    %99 = arith.truncf %98 : vector<8x16xf32> to vector<8x16xbf16>
    %cst_31 = arith.constant dense<0.000000e+00> : vector<8x8xf32>
    %100 = tpu.matmul %99, %97, %cst_31 {dimension_numbers = #tpu.dot_dimension_numbers<[1], [1], [0], [0], [0, 0, 1, 0], [], []>} : vector<8x16xbf16>, vector<8x16xbf16>, vector<8x8xf32> -> vector<8x8xf32>
    %101 = vector.extract_strided_slice %92 {offsets = [0, 0], sizes = [8, 1], strides = [1, 1]} : vector<8x4xf32> to vector<8x1xf32>
    %102 = tpu.transpose %101, [1, 0] : vector<8x1xf32> -> vector<1x8xf32>
    %103 = vector.broadcast %102 : vector<1x8xf32> to vector<8x8xf32>
    %104 = vector.broadcast %101 : vector<8x1xf32> to vector<8x8xf32>
    %105 = arith.subf %103, %104 : vector<8x8xf32>
    %cst_32 = arith.constant 0.000000e+00 : f32
    %106 = vector.broadcast %cst_32 : f32 to vector<8x8xf32>
    %107 = arith.minimumf %105, %106 : vector<8x8xf32>
    %108 = math.exp %107 : vector<8x8xf32>
    %109 = arith.mulf %108, %86 : vector<8x8xf32>
    %110 = vector.extract_strided_slice %93 {offsets = [0, 0], sizes = [8, 16], strides = [1, 1]} : vector<8x64xf32> to vector<8x16xf32>
    %111 = arith.mulf %100, %109 : vector<8x8xf32>
    %112 = arith.truncf %111 : vector<8x8xf32> to vector<8x8xbf16>
    %113 = arith.truncf %110 : vector<8x16xf32> to vector<8x16xbf16>
    %cst_33 = arith.constant dense<0.000000e+00> : vector<8x16xf32>
    %114 = tpu.matmul %112, %113, %cst_33 {dimension_numbers = #tpu.dot_dimension_numbers<[1], [0], [0], [1], [0, 0, 1, 1], [], []>} : vector<8x8xbf16>, vector<8x16xbf16>, vector<8x16xf32> -> vector<8x16xf32>
    %115 = vector.extract_strided_slice %94 {offsets = [0, 16], sizes = [8, 16], strides = [1, 1]} : vector<8x64xf32> to vector<8x16xf32>
    %116 = arith.truncf %115 : vector<8x16xf32> to vector<8x16xbf16>
    %117 = vector.extract_strided_slice %95 {offsets = [0, 16], sizes = [8, 16], strides = [1, 1]} : vector<8x64xf32> to vector<8x16xf32>
    %118 = arith.truncf %117 : vector<8x16xf32> to vector<8x16xbf16>
    %cst_34 = arith.constant dense<0.000000e+00> : vector<8x8xf32>
    %119 = tpu.matmul %118, %116, %cst_34 {dimension_numbers = #tpu.dot_dimension_numbers<[1], [1], [0], [0], [0, 0, 1, 0], [], []>} : vector<8x16xbf16>, vector<8x16xbf16>, vector<8x8xf32> -> vector<8x8xf32>
    %120 = vector.extract_strided_slice %92 {offsets = [0, 1], sizes = [8, 1], strides = [1, 1]} : vector<8x4xf32> to vector<8x1xf32>
    %121 = tpu.transpose %120, [1, 0] : vector<8x1xf32> -> vector<1x8xf32>
    %122 = vector.broadcast %121 : vector<1x8xf32> to vector<8x8xf32>
    %123 = vector.broadcast %120 : vector<8x1xf32> to vector<8x8xf32>
    %124 = arith.subf %122, %123 : vector<8x8xf32>
    %cst_35 = arith.constant 0.000000e+00 : f32
    %125 = vector.broadcast %cst_35 : f32 to vector<8x8xf32>
    %126 = arith.minimumf %124, %125 : vector<8x8xf32>
    %127 = math.exp %126 : vector<8x8xf32>
    %128 = arith.mulf %127, %86 : vector<8x8xf32>
    %129 = vector.extract_strided_slice %93 {offsets = [0, 16], sizes = [8, 16], strides = [1, 1]} : vector<8x64xf32> to vector<8x16xf32>
    %130 = arith.mulf %119, %128 : vector<8x8xf32>
    %131 = arith.truncf %130 : vector<8x8xf32> to vector<8x8xbf16>
    %132 = arith.truncf %129 : vector<8x16xf32> to vector<8x16xbf16>
    %cst_36 = arith.constant dense<0.000000e+00> : vector<8x16xf32>
    %133 = tpu.matmul %131, %132, %cst_36 {dimension_numbers = #tpu.dot_dimension_numbers<[1], [0], [0], [1], [0, 0, 1, 1], [], []>} : vector<8x8xbf16>, vector<8x16xbf16>, vector<8x16xf32> -> vector<8x16xf32>
    %134 = vector.extract_strided_slice %94 {offsets = [0, 32], sizes = [8, 16], strides = [1, 1]} : vector<8x64xf32> to vector<8x16xf32>
    %135 = arith.truncf %134 : vector<8x16xf32> to vector<8x16xbf16>
    %136 = vector.extract_strided_slice %95 {offsets = [0, 32], sizes = [8, 16], strides = [1, 1]} : vector<8x64xf32> to vector<8x16xf32>
    %137 = arith.truncf %136 : vector<8x16xf32> to vector<8x16xbf16>
    %cst_37 = arith.constant dense<0.000000e+00> : vector<8x8xf32>
    %138 = tpu.matmul %137, %135, %cst_37 {dimension_numbers = #tpu.dot_dimension_numbers<[1], [1], [0], [0], [0, 0, 1, 0], [], []>} : vector<8x16xbf16>, vector<8x16xbf16>, vector<8x8xf32> -> vector<8x8xf32>
    %139 = vector.extract_strided_slice %92 {offsets = [0, 2], sizes = [8, 1], strides = [1, 1]} : vector<8x4xf32> to vector<8x1xf32>
    %140 = tpu.transpose %139, [1, 0] : vector<8x1xf32> -> vector<1x8xf32>
    %141 = vector.broadcast %140 : vector<1x8xf32> to vector<8x8xf32>
    %142 = vector.broadcast %139 : vector<8x1xf32> to vector<8x8xf32>
    %143 = arith.subf %141, %142 : vector<8x8xf32>
    %cst_38 = arith.constant 0.000000e+00 : f32
    %144 = vector.broadcast %cst_38 : f32 to vector<8x8xf32>
    %145 = arith.minimumf %143, %144 : vector<8x8xf32>
    %146 = math.exp %145 : vector<8x8xf32>
    %147 = arith.mulf %146, %86 : vector<8x8xf32>
    %148 = vector.extract_strided_slice %93 {offsets = [0, 32], sizes = [8, 16], strides = [1, 1]} : vector<8x64xf32> to vector<8x16xf32>
    %149 = arith.mulf %138, %147 : vector<8x8xf32>
    %150 = arith.truncf %149 : vector<8x8xf32> to vector<8x8xbf16>
    %151 = arith.truncf %148 : vector<8x16xf32> to vector<8x16xbf16>
    %cst_39 = arith.constant dense<0.000000e+00> : vector<8x16xf32>
    %152 = tpu.matmul %150, %151, %cst_39 {dimension_numbers = #tpu.dot_dimension_numbers<[1], [0], [0], [1], [0, 0, 1, 1], [], []>} : vector<8x8xbf16>, vector<8x16xbf16>, vector<8x16xf32> -> vector<8x16xf32>
    %153 = vector.extract_strided_slice %94 {offsets = [0, 48], sizes = [8, 16], strides = [1, 1]} : vector<8x64xf32> to vector<8x16xf32>
    %154 = arith.truncf %153 : vector<8x16xf32> to vector<8x16xbf16>
    %155 = vector.extract_strided_slice %95 {offsets = [0, 48], sizes = [8, 16], strides = [1, 1]} : vector<8x64xf32> to vector<8x16xf32>
    %156 = arith.truncf %155 : vector<8x16xf32> to vector<8x16xbf16>
    %cst_40 = arith.constant dense<0.000000e+00> : vector<8x8xf32>
    %157 = tpu.matmul %156, %154, %cst_40 {dimension_numbers = #tpu.dot_dimension_numbers<[1], [1], [0], [0], [0, 0, 1, 0], [], []>} : vector<8x16xbf16>, vector<8x16xbf16>, vector<8x8xf32> -> vector<8x8xf32>
    %158 = vector.extract_strided_slice %92 {offsets = [0, 3], sizes = [8, 1], strides = [1, 1]} : vector<8x4xf32> to vector<8x1xf32>
    %159 = tpu.transpose %158, [1, 0] : vector<8x1xf32> -> vector<1x8xf32>
    %160 = vector.broadcast %159 : vector<1x8xf32> to vector<8x8xf32>
    %161 = vector.broadcast %158 : vector<8x1xf32> to vector<8x8xf32>
    %162 = arith.subf %160, %161 : vector<8x8xf32>
    %cst_41 = arith.constant 0.000000e+00 : f32
    %163 = vector.broadcast %cst_41 : f32 to vector<8x8xf32>
    %164 = arith.minimumf %162, %163 : vector<8x8xf32>
    %165 = math.exp %164 : vector<8x8xf32>
    %166 = arith.mulf %165, %86 : vector<8x8xf32>
    %167 = vector.extract_strided_slice %93 {offsets = [0, 48], sizes = [8, 16], strides = [1, 1]} : vector<8x64xf32> to vector<8x16xf32>
    %168 = arith.mulf %157, %166 : vector<8x8xf32>
    %169 = arith.truncf %168 : vector<8x8xf32> to vector<8x8xbf16>
    %170 = arith.truncf %167 : vector<8x16xf32> to vector<8x16xbf16>
    %cst_42 = arith.constant dense<0.000000e+00> : vector<8x16xf32>
    %171 = tpu.matmul %169, %170, %cst_42 {dimension_numbers = #tpu.dot_dimension_numbers<[1], [0], [0], [1], [0, 0, 1, 1], [], []>} : vector<8x8xbf16>, vector<8x16xbf16>, vector<8x16xf32> -> vector<8x16xf32>
    %172 = tpu.concatenate %114, %133, %152, %171 in 1 : vector<8x16xf32>, vector<8x16xf32>, vector<8x16xf32>, vector<8x16xf32> -> vector<8x64xf32>
    %173 = vector.extract_strided_slice %81 {offsets = [8, 0], sizes = [8, 4], strides = [1, 1]} : vector<16x4xf32> to vector<8x4xf32>
    %cst_43 = arith.constant dense<0.000000e+00> : vector<8x4xf32>
    %174 = tpu.matmul %86, %173, %cst_43 {dimension_numbers = #tpu.dot_dimension_numbers<[1], [0], [0], [1], [0, 0, 1, 1], [], []>} : vector<8x8xf32>, vector<8x4xf32>, vector<8x4xf32> -> vector<8x4xf32>
    %175 = vector.extract_strided_slice %67 {offsets = [8, 0], sizes = [8, 64], strides = [1, 1]} : vector<16x64xf32> to vector<8x64xf32>
    %176 = vector.extract_strided_slice %68 {offsets = [8, 0], sizes = [8, 64], strides = [1, 1]} : vector<16x64xf32> to vector<8x64xf32>
    %177 = vector.extract_strided_slice %69 {offsets = [8, 0], sizes = [8, 64], strides = [1, 1]} : vector<16x64xf32> to vector<8x64xf32>
    %178 = vector.extract_strided_slice %176 {offsets = [0, 0], sizes = [8, 16], strides = [1, 1]} : vector<8x64xf32> to vector<8x16xf32>
    %179 = arith.truncf %178 : vector<8x16xf32> to vector<8x16xbf16>
    %180 = vector.extract_strided_slice %177 {offsets = [0, 0], sizes = [8, 16], strides = [1, 1]} : vector<8x64xf32> to vector<8x16xf32>
    %181 = arith.truncf %180 : vector<8x16xf32> to vector<8x16xbf16>
    %cst_44 = arith.constant dense<0.000000e+00> : vector<8x8xf32>
    %182 = tpu.matmul %181, %179, %cst_44 {dimension_numbers = #tpu.dot_dimension_numbers<[1], [1], [0], [0], [0, 0, 1, 0], [], []>} : vector<8x16xbf16>, vector<8x16xbf16>, vector<8x8xf32> -> vector<8x8xf32>
    %183 = vector.extract_strided_slice %174 {offsets = [0, 0], sizes = [8, 1], strides = [1, 1]} : vector<8x4xf32> to vector<8x1xf32>
    %184 = tpu.transpose %183, [1, 0] : vector<8x1xf32> -> vector<1x8xf32>
    %185 = vector.broadcast %184 : vector<1x8xf32> to vector<8x8xf32>
    %186 = vector.broadcast %183 : vector<8x1xf32> to vector<8x8xf32>
    %187 = arith.subf %185, %186 : vector<8x8xf32>
    %cst_45 = arith.constant 0.000000e+00 : f32
    %188 = vector.broadcast %cst_45 : f32 to vector<8x8xf32>
    %189 = arith.minimumf %187, %188 : vector<8x8xf32>
    %190 = math.exp %189 : vector<8x8xf32>
    %191 = arith.mulf %190, %86 : vector<8x8xf32>
    %192 = vector.extract_strided_slice %175 {offsets = [0, 0], sizes = [8, 16], strides = [1, 1]} : vector<8x64xf32> to vector<8x16xf32>
    %193 = arith.mulf %182, %191 : vector<8x8xf32>
    %194 = arith.truncf %193 : vector<8x8xf32> to vector<8x8xbf16>
    %195 = arith.truncf %192 : vector<8x16xf32> to vector<8x16xbf16>
    %cst_46 = arith.constant dense<0.000000e+00> : vector<8x16xf32>
    %196 = tpu.matmul %194, %195, %cst_46 {dimension_numbers = #tpu.dot_dimension_numbers<[1], [0], [0], [1], [0, 0, 1, 1], [], []>} : vector<8x8xbf16>, vector<8x16xbf16>, vector<8x16xf32> -> vector<8x16xf32>
    %197 = vector.extract_strided_slice %176 {offsets = [0, 16], sizes = [8, 16], strides = [1, 1]} : vector<8x64xf32> to vector<8x16xf32>
    %198 = arith.truncf %197 : vector<8x16xf32> to vector<8x16xbf16>
    %199 = vector.extract_strided_slice %177 {offsets = [0, 16], sizes = [8, 16], strides = [1, 1]} : vector<8x64xf32> to vector<8x16xf32>
    %200 = arith.truncf %199 : vector<8x16xf32> to vector<8x16xbf16>
    %cst_47 = arith.constant dense<0.000000e+00> : vector<8x8xf32>
    %201 = tpu.matmul %200, %198, %cst_47 {dimension_numbers = #tpu.dot_dimension_numbers<[1], [1], [0], [0], [0, 0, 1, 0], [], []>} : vector<8x16xbf16>, vector<8x16xbf16>, vector<8x8xf32> -> vector<8x8xf32>
    %202 = vector.extract_strided_slice %174 {offsets = [0, 1], sizes = [8, 1], strides = [1, 1]} : vector<8x4xf32> to vector<8x1xf32>
    %203 = tpu.transpose %202, [1, 0] : vector<8x1xf32> -> vector<1x8xf32>
    %204 = vector.broadcast %203 : vector<1x8xf32> to vector<8x8xf32>
    %205 = vector.broadcast %202 : vector<8x1xf32> to vector<8x8xf32>
    %206 = arith.subf %204, %205 : vector<8x8xf32>
    %cst_48 = arith.constant 0.000000e+00 : f32
    %207 = vector.broadcast %cst_48 : f32 to vector<8x8xf32>
    %208 = arith.minimumf %206, %207 : vector<8x8xf32>
    %209 = math.exp %208 : vector<8x8xf32>
    %210 = arith.mulf %209, %86 : vector<8x8xf32>
    %211 = vector.extract_strided_slice %175 {offsets = [0, 16], sizes = [8, 16], strides = [1, 1]} : vector<8x64xf32> to vector<8x16xf32>
    %212 = arith.mulf %201, %210 : vector<8x8xf32>
    %213 = arith.truncf %212 : vector<8x8xf32> to vector<8x8xbf16>
    %214 = arith.truncf %211 : vector<8x16xf32> to vector<8x16xbf16>
    %cst_49 = arith.constant dense<0.000000e+00> : vector<8x16xf32>
    %215 = tpu.matmul %213, %214, %cst_49 {dimension_numbers = #tpu.dot_dimension_numbers<[1], [0], [0], [1], [0, 0, 1, 1], [], []>} : vector<8x8xbf16>, vector<8x16xbf16>, vector<8x16xf32> -> vector<8x16xf32>
    %216 = vector.extract_strided_slice %176 {offsets = [0, 32], sizes = [8, 16], strides = [1, 1]} : vector<8x64xf32> to vector<8x16xf32>
    %217 = arith.truncf %216 : vector<8x16xf32> to vector<8x16xbf16>
    %218 = vector.extract_strided_slice %177 {offsets = [0, 32], sizes = [8, 16], strides = [1, 1]} : vector<8x64xf32> to vector<8x16xf32>
    %219 = arith.truncf %218 : vector<8x16xf32> to vector<8x16xbf16>
    %cst_50 = arith.constant dense<0.000000e+00> : vector<8x8xf32>
    %220 = tpu.matmul %219, %217, %cst_50 {dimension_numbers = #tpu.dot_dimension_numbers<[1], [1], [0], [0], [0, 0, 1, 0], [], []>} : vector<8x16xbf16>, vector<8x16xbf16>, vector<8x8xf32> -> vector<8x8xf32>
    %221 = vector.extract_strided_slice %174 {offsets = [0, 2], sizes = [8, 1], strides = [1, 1]} : vector<8x4xf32> to vector<8x1xf32>
    %222 = tpu.transpose %221, [1, 0] : vector<8x1xf32> -> vector<1x8xf32>
    %223 = vector.broadcast %222 : vector<1x8xf32> to vector<8x8xf32>
    %224 = vector.broadcast %221 : vector<8x1xf32> to vector<8x8xf32>
    %225 = arith.subf %223, %224 : vector<8x8xf32>
    %cst_51 = arith.constant 0.000000e+00 : f32
    %226 = vector.broadcast %cst_51 : f32 to vector<8x8xf32>
    %227 = arith.minimumf %225, %226 : vector<8x8xf32>
    %228 = math.exp %227 : vector<8x8xf32>
    %229 = arith.mulf %228, %86 : vector<8x8xf32>
    %230 = vector.extract_strided_slice %175 {offsets = [0, 32], sizes = [8, 16], strides = [1, 1]} : vector<8x64xf32> to vector<8x16xf32>
    %231 = arith.mulf %220, %229 : vector<8x8xf32>
    %232 = arith.truncf %231 : vector<8x8xf32> to vector<8x8xbf16>
    %233 = arith.truncf %230 : vector<8x16xf32> to vector<8x16xbf16>
    %cst_52 = arith.constant dense<0.000000e+00> : vector<8x16xf32>
    %234 = tpu.matmul %232, %233, %cst_52 {dimension_numbers = #tpu.dot_dimension_numbers<[1], [0], [0], [1], [0, 0, 1, 1], [], []>} : vector<8x8xbf16>, vector<8x16xbf16>, vector<8x16xf32> -> vector<8x16xf32>
    %235 = vector.extract_strided_slice %176 {offsets = [0, 48], sizes = [8, 16], strides = [1, 1]} : vector<8x64xf32> to vector<8x16xf32>
    %236 = arith.truncf %235 : vector<8x16xf32> to vector<8x16xbf16>
    %237 = vector.extract_strided_slice %177 {offsets = [0, 48], sizes = [8, 16], strides = [1, 1]} : vector<8x64xf32> to vector<8x16xf32>
    %238 = arith.truncf %237 : vector<8x16xf32> to vector<8x16xbf16>
    %cst_53 = arith.constant dense<0.000000e+00> : vector<8x8xf32>
    %239 = tpu.matmul %238, %236, %cst_53 {dimension_numbers = #tpu.dot_dimension_numbers<[1], [1], [0], [0], [0, 0, 1, 0], [], []>} : vector<8x16xbf16>, vector<8x16xbf16>, vector<8x8xf32> -> vector<8x8xf32>
    %240 = vector.extract_strided_slice %174 {offsets = [0, 3], sizes = [8, 1], strides = [1, 1]} : vector<8x4xf32> to vector<8x1xf32>
    %241 = tpu.transpose %240, [1, 0] : vector<8x1xf32> -> vector<1x8xf32>
    %242 = vector.broadcast %241 : vector<1x8xf32> to vector<8x8xf32>
    %243 = vector.broadcast %240 : vector<8x1xf32> to vector<8x8xf32>
    %244 = arith.subf %242, %243 : vector<8x8xf32>
    %cst_54 = arith.constant 0.000000e+00 : f32
    %245 = vector.broadcast %cst_54 : f32 to vector<8x8xf32>
    %246 = arith.minimumf %244, %245 : vector<8x8xf32>
    %247 = math.exp %246 : vector<8x8xf32>
    %248 = arith.mulf %247, %86 : vector<8x8xf32>
    %249 = vector.extract_strided_slice %175 {offsets = [0, 48], sizes = [8, 16], strides = [1, 1]} : vector<8x64xf32> to vector<8x16xf32>
    %250 = arith.mulf %239, %248 : vector<8x8xf32>
    %251 = arith.truncf %250 : vector<8x8xf32> to vector<8x8xbf16>
    %252 = arith.truncf %249 : vector<8x16xf32> to vector<8x16xbf16>
    %cst_55 = arith.constant dense<0.000000e+00> : vector<8x16xf32>
    %253 = tpu.matmul %251, %252, %cst_55 {dimension_numbers = #tpu.dot_dimension_numbers<[1], [0], [0], [1], [0, 0, 1, 1], [], []>} : vector<8x8xbf16>, vector<8x16xbf16>, vector<8x16xf32> -> vector<8x16xf32>
    %254 = tpu.concatenate %196, %215, %234, %253 in 1 : vector<8x16xf32>, vector<8x16xf32>, vector<8x16xf32>, vector<8x16xf32> -> vector<8x64xf32>
    %255 = tpu.concatenate %172, %254 in 0 : vector<8x64xf32>, vector<8x64xf32> -> vector<16x64xf32>
    %256 = arith.addf %90, %255 : vector<16x64xf32>
    %c0_56 = arith.constant 0 : index
    %c0_57 = arith.constant 0 : index
    %c0_58 = arith.constant 0 : index
    %257 = vector.load %arg8[%c0_56, %c0_57, %c0_58] : memref<1x1x64xf32, #tpu.memory_space<vmem>>, vector<1x1x64xf32>
    %258 = vector.shape_cast %257 : vector<1x1x64xf32> to vector<1x64xf32>
    %259 = vector.broadcast %258 : vector<1x64xf32> to vector<16x64xf32>
    %260 = arith.addf %70, %259 : vector<16x64xf32>
    %cst_59 = arith.constant 0.000000e+00 : f32
    %261 = vector.broadcast %cst_59 : f32 to vector<16x64xf32>
    %262 = arith.subf %261, %260 : vector<16x64xf32>
    %263 = math.exp %262 : vector<16x64xf32>
    %cst_60 = arith.constant 1.000000e+00 : f32
    %264 = vector.broadcast %cst_60 : f32 to vector<16x64xf32>
    %265 = arith.addf %264, %263 : vector<16x64xf32>
    %cst_61 = arith.constant 1.000000e+00 : f32
    %266 = vector.broadcast %cst_61 : f32 to vector<16x64xf32>
    %267 = arith.divf %266, %265 : vector<16x64xf32>
    %268 = arith.mulf %260, %267 : vector<16x64xf32>
    %269 = arith.mulf %256, %268 : vector<16x64xf32>
    %270 = arith.truncf %269 : vector<16x64xf32> to vector<16x64xbf16>
    %c0_62 = arith.constant 0 : index
    %c0_63 = arith.constant 0 : index
    %c0_64 = arith.constant 0 : index
    %271 = vector.load %arg9[%c0_62, %c0_63, %c0_64] : memref<1x64x64xbf16, #tpu.memory_space<vmem>>, vector<1x64x64xbf16>
    %272 = vector.shape_cast %271 : vector<1x64x64xbf16> to vector<64x64xbf16>
    %cst_65 = arith.constant dense<0.000000e+00> : vector<16x64xf32>
    %273 = tpu.matmul %270, %272, %cst_65 {dimension_numbers = #tpu.dot_dimension_numbers<[1], [0], [0], [1], [0, 0, 1, 1], [], []>} : vector<16x64xbf16>, vector<64x64xbf16>, vector<16x64xf32> -> vector<16x64xf32>
    %274 = arith.addf %273, %4 : vector<16x64xf32>
    %275 = arith.mulf %274, %274 : vector<16x64xf32>
    %cst_66 = arith.constant dense<0.000000e+00> : vector<16xf32>
    %276 = vector.multi_reduction <add>, %275, %cst_66 [1] : vector<16x64xf32> to vector<16xf32>
    %277 = vector.shape_cast %276 : vector<16xf32> to vector<16x1xf32>
    %cst_67 = arith.constant 6.400000e+01 : f32
    %278 = vector.broadcast %cst_67 : f32 to vector<16x1xf32>
    %279 = arith.divf %277, %278 : vector<16x1xf32>
    %cst_68 = arith.constant 9.99999974E-6 : f32
    %280 = vector.broadcast %cst_68 : f32 to vector<16x1xf32>
    %281 = arith.addf %279, %280 : vector<16x1xf32>
    %282 = math.rsqrt %281 : vector<16x1xf32>
    %283 = vector.broadcast %282 : vector<16x1xf32> to vector<16x64xf32>
    %284 = arith.mulf %274, %283 : vector<16x64xf32>
    %c0_69 = arith.constant 0 : index
    %c0_70 = arith.constant 0 : index
    %c0_71 = arith.constant 0 : index
    %285 = vector.load %arg3[%c0_69, %c0_70, %c0_71] : memref<1x1x64xf32, #tpu.memory_space<vmem>>, vector<1x1x64xf32>
    %286 = vector.shape_cast %285 : vector<1x1x64xf32> to vector<1x64xf32>
    %287 = vector.broadcast %286 : vector<1x64xf32> to vector<16x64xf32>
    %288 = arith.mulf %284, %287 : vector<16x64xf32>
    %289 = arith.truncf %288 : vector<16x64xf32> to vector<16x64xbf16>
    %c0_72 = arith.constant 0 : index
    %c0_73 = arith.constant 0 : index
    %c0_74 = arith.constant 0 : index
    %290 = vector.load %arg10[%c0_72, %c0_73, %c0_74] : memref<1x64x256xbf16, #tpu.memory_space<vmem>>, vector<1x64x256xbf16>
    %291 = vector.shape_cast %290 : vector<1x64x256xbf16> to vector<64x256xbf16>
    %cst_75 = arith.constant dense<0.000000e+00> : vector<16x256xf32>
    %292 = tpu.matmul %289, %291, %cst_75 {dimension_numbers = #tpu.dot_dimension_numbers<[1], [0], [0], [1], [0, 0, 1, 1], [], []>} : vector<16x64xbf16>, vector<64x256xbf16>, vector<16x256xf32> -> vector<16x256xf32>
    %293 = vector.extract_strided_slice %292 {offsets = [0, 0], sizes = [16, 128], strides = [1, 1]} : vector<16x256xf32> to vector<16x128xf32>
    %cst_76 = arith.constant 0.000000e+00 : f32
    %294 = vector.broadcast %cst_76 : f32 to vector<16x128xf32>
    %295 = arith.subf %294, %293 : vector<16x128xf32>
    %296 = math.exp %295 : vector<16x128xf32>
    %cst_77 = arith.constant 1.000000e+00 : f32
    %297 = vector.broadcast %cst_77 : f32 to vector<16x128xf32>
    %298 = arith.addf %297, %296 : vector<16x128xf32>
    %cst_78 = arith.constant 1.000000e+00 : f32
    %299 = vector.broadcast %cst_78 : f32 to vector<16x128xf32>
    %300 = arith.divf %299, %298 : vector<16x128xf32>
    %301 = arith.mulf %293, %300 : vector<16x128xf32>
    %302 = vector.extract_strided_slice %292 {offsets = [0, 128], sizes = [16, 128], strides = [1, 1]} : vector<16x256xf32> to vector<16x128xf32>
    %303 = arith.mulf %301, %302 : vector<16x128xf32>
    %304 = arith.truncf %303 : vector<16x128xf32> to vector<16x128xbf16>
    %c0_79 = arith.constant 0 : index
    %c0_80 = arith.constant 0 : index
    %c0_81 = arith.constant 0 : index
    %305 = vector.load %arg11[%c0_79, %c0_80, %c0_81] : memref<1x128x64xbf16, #tpu.memory_space<vmem>>, vector<1x128x64xbf16>
    %306 = vector.shape_cast %305 : vector<1x128x64xbf16> to vector<128x64xbf16>
    %cst_82 = arith.constant dense<0.000000e+00> : vector<16x64xf32>
    %307 = tpu.matmul %304, %306, %cst_82 {dimension_numbers = #tpu.dot_dimension_numbers<[1], [0], [0], [1], [0, 0, 1, 1], [], []>} : vector<16x128xbf16>, vector<128x64xbf16>, vector<16x64xf32> -> vector<16x64xf32>
    %308 = arith.addf %307, %274 : vector<16x64xf32>
    %309 = vector.shape_cast %308 : vector<16x64xf32> to vector<2x8x64xf32>
    %c0_83 = arith.constant 0 : index
    %c0_84 = arith.constant 0 : index
    %c0_85 = arith.constant 0 : index
    %310 = vector.load %arg12[%c0_83, %c0_84, %c0_85] : memref<2x8x64xf32, #tpu.memory_space<vmem>>, vector<2x8x64xf32>
    tpu.vector_store %arg12[%c0_83, %c0_84, %c0_85], %309 {strides = array<i32>} : memref<2x8x64xf32, #tpu.memory_space<vmem>>, vector<2x8x64xf32>,
    return
  }
  func.func @transform_0(%arg0: i32) -> (i32, i32, i32) {
    %c0_i32 = arith.constant 0 : i32
    %c0_i32_0 = arith.constant 0 : i32
    %c0_i32_1 = arith.constant 0 : i32
    %c0_i32_2 = arith.constant 0 : i32
    return %c0_i32, %c0_i32_0, %c0_i32_1 : i32, i32, i32
  }
  func.func @transform_1(%arg0: i32) -> (i32, i32, i32) {
    %c0_i32 = arith.constant 0 : i32
    %c0_i32_0 = arith.constant 0 : i32
    %c0_i32_1 = arith.constant 0 : i32
    return %arg0, %c0_i32, %c0_i32_0 : i32, i32, i32
  }
  func.func @transform_2(%arg0: i32) -> (i32, i32, i32) {
    %c0_i32 = arith.constant 0 : i32
    %c0_i32_0 = arith.constant 0 : i32
    %c0_i32_1 = arith.constant 0 : i32
    return %arg0, %c0_i32, %c0_i32_0 : i32, i32, i32
  }
  func.func @transform_3(%arg0: i32) -> (i32, i32, i32) {
    %c0_i32 = arith.constant 0 : i32
    %c0_i32_0 = arith.constant 0 : i32
    %c0_i32_1 = arith.constant 0 : i32
    return %arg0, %c0_i32, %c0_i32_0 : i32, i32, i32
  }
  func.func @transform_4(%arg0: i32) -> (i32, i32, i32) {
    %c0_i32 = arith.constant 0 : i32
    %c0_i32_0 = arith.constant 0 : i32
    %c0_i32_1 = arith.constant 0 : i32
    return %arg0, %c0_i32, %c0_i32_0 : i32, i32, i32
  }
  func.func @transform_5(%arg0: i32) -> (i32, i32, i32) {
    %c0_i32 = arith.constant 0 : i32
    %c0_i32_0 = arith.constant 0 : i32
    %c0_i32_1 = arith.constant 0 : i32
    return %arg0, %c0_i32, %c0_i32_0 : i32, i32, i32
  }
  func.func @transform_6(%arg0: i32) -> (i32, i32, i32) {
    %c0_i32 = arith.constant 0 : i32
    %c0_i32_0 = arith.constant 0 : i32
    %c0_i32_1 = arith.constant 0 : i32
    return %arg0, %c0_i32, %c0_i32_0 : i32, i32, i32
  }
  func.func @transform_7(%arg0: i32) -> (i32, i32, i32) {
    %c0_i32 = arith.constant 0 : i32
    %c0_i32_0 = arith.constant 0 : i32
    %c0_i32_1 = arith.constant 0 : i32
    return %arg0, %c0_i32, %c0_i32_0 : i32, i32, i32
  }
  func.func @transform_8(%arg0: i32) -> (i32, i32, i32) {
    %c0_i32 = arith.constant 0 : i32
    %c0_i32_0 = arith.constant 0 : i32
    %c0_i32_1 = arith.constant 0 : i32
    return %arg0, %c0_i32, %c0_i32_0 : i32, i32, i32
  }
  func.func @transform_9(%arg0: i32) -> (i32, i32, i32) {
    %c0_i32 = arith.constant 0 : i32
    %c0_i32_0 = arith.constant 0 : i32
    %c0_i32_1 = arith.constant 0 : i32
    return %arg0, %c0_i32, %c0_i32_0 : i32, i32, i32
  }
  func.func @transform_10(%arg0: i32) -> (i32, i32, i32) {
    %c0_i32 = arith.constant 0 : i32
    %c0_i32_0 = arith.constant 0 : i32
    %c0_i32_1 = arith.constant 0 : i32
    return %arg0, %c0_i32, %c0_i32_0 : i32, i32, i32
  }
  func.func @transform_11(%arg0: i32) -> (i32, i32, i32) {
    %c0_i32 = arith.constant 0 : i32
    %c0_i32_0 = arith.constant 0 : i32
    %c0_i32_1 = arith.constant 0 : i32
    %c0_i32_2 = arith.constant 0 : i32
    return %c0_i32, %c0_i32_0, %c0_i32_1 : i32, i32, i32
  }
}

</mosaic_0001>

<bundles_post_ra>
// kernel: llamba_forward.3
= control target key start
LH: loop header
LB: loop body
LE: loop exit
PB: predicated region body
PF: predicated region fallthrough
CT: control target
= control target key end

     0   :  { %10 = vsyncpa [#allocation4], 0  ;;  %vm27_vm0 = vcmask 523264   ;;  %s317_s0 = inlined_call_operand.vmem [shape: f32[16,64], index: 0, kind: input, shape index: {}]   ;;  %s318_s1 = inlined_call_operand.vmem [shape: f32[1,64], index: 1, kind: input, shape index: {}]   ;;  %s319_s2 = inlined_call_operand.vmem [shape: bf16[64,128], index: 2, kind: input, shape index: {}]   ;;  %s320_s3 = inlined_call_operand.hbm [shape: f32[16,128], index: 3, kind: output, shape index: {0}]   ;;  %s321_s4 = inlined_call_operand.hbm [shape: f32[16,64], index: 4, kind: output, shape index: {1}]  }
   0x1   :  { %v23_v0 = vld [vmem:[%s317_s0] sm:$0xff] }
   0x2   :  { %v25_v1 = vmul.f32 %v23_v0, %v23_v0 }
   0x3   :  { %11 = vsyncpa [#allocation6], 0  ;;  %v24_v2 = vld [vmem:[%s317_s0 + $0x8] sm:$0xff]  ;;  %v253_v6 = vmov 64.0   ;;  %v188_v12 = vld [vmem:[%s319_s2 + $0x18] sm:$0xff]  ;;  %s151_s30 = sshll.u32 %s321_s4, 4  ;;  %s152_s30 = int_to_ptr.hbm [resolvable:$true] %s151_s30 }
   0x4   :  { %v28_v3 = vsel %vm27_vm0, %v25_v1, 0.0  ;;  %v26_v4 = vmul.f32 %v24_v2, %v24_v2  ;;  %195 = vrcp.f32 %v253_v6  ;;  %120 = vmatpush.bf16.msra.mxu0 %v188_v12  ;;  %v187_v16 = vld [vmem:[%s319_s2 + $0x10] sm:$0xff]  ;;  %v186_v18 = vld [vmem:[%s319_s2 + $0x8] sm:$0xff]  ;;  %v185_v19 = vld [vmem:[%s319_s2] sm:$0xff]  ;;  %s255_s5 = smov 128   ;;  %s256_s6 = smov 8  }
   0x5   :  { %29 = vadd.xlane.f32.xlu0 %v28_v3  ;;  %v194_v31 = vld [vmem:[%s318_s1] ss:$0 sm:$0xff]  ;;  %s254_s1 = smov [#allocation5]   ;;  %s257_s7 = smov [#allocation3]  }
   0x6   :  { %v31_v5 = vsel %vm27_vm0, %v26_v4, 0.0  ;;  %s149_s2 = sshll.u32 %s254_s1, 4  ;;  %s136_s8 = sshll.u32 %s257_s7, 4  ;;  %s150_s2 = int_to_ptr.vmem [resolvable:$true] %s149_s2  ;;  %s137_s8 = int_to_ptr.vmem [resolvable:$true] %s136_s8 }
   0x7   :  { %s138_s11 = sshll.u32 %s320_s3, 4  ;;  %s139_s11 = int_to_ptr.hbm [resolvable:$true] %s138_s11 }
   0x8   :  { %121 = vmatpush.bf16.msra.mxu0 %v187_v16 }
   0xa   :  { %v196_v7 = vpop.eup %195 }
   0xb   :  { %v35_v8 = vmul.f32 64.0, %v196_v7  ;;  %vm39_vm1 = vweird.f32 %v196_v7 }
   0xc   :  { %122 = vmatpush.bf16.msra.mxu0 %v186_v18 }
   0xd   :  { %32 = vadd.xlane.f32.xlu0 %v31_v5  ;;  %v36_v9 = vsub.f32 1.0, %v35_v8 }
   0xf   :  { %v37_v10 = vmul.f32 %v196_v7, %v36_v9 }
  0x10   :  { %123 = vmatpush.bf16.msra.mxu0 %v185_v19 }
  0x11   :  { %v38_v11 = vadd.f32 %v196_v7, %v37_v10 }
  0x13   :  { %v40_v13 = vsel %vm39_vm1, %v196_v7, %v38_v11 }
  0x78   :  { %v30_v14 = vpop.xlane.xlu0 %29 }
  0x79   :  { %v41_v15 = vmul.f32 %v40_v13, %v30_v14 }
  0x7b   :  { %v43_v17 = vadd.f32 1e-05, %v41_v15 }
  0x7d   :  { %197 = vrsqrt.f32 %v43_v17  ;;  %vm51_vm3 = vweird.f32 %v43_v17 }
  0x80   :  { %v33_v20 = vpop.xlane.xlu0 %32 }
  0x81   :  { %v42_v21 = vmul.f32 %v40_v13, %v33_v20 }
  0x83   :  { %v198_v22 = vpop.eup %197  ;;  %v44_v23 = vadd.f32 1e-05, %v42_v21 }
  0x84   :  { %v46_v24 = vmul.f32 %v198_v22, %v43_v17  ;;  %vm52_vm2 = vweird.f32 %v198_v22 }
  0x85   :  { %199 = vrsqrt.f32 %v44_v23  ;;  %vm53_vm4 = vmor %vm51_vm3, %vm52_vm2  ;;  %vm61_vm6 = vweird.f32 %v44_v23 }
  0x86   :  { %v47_v25 = vmul.f32 %v198_v22, %v46_v24 }
  0x88   :  { %v48_v26 = vmul.f32 0.5, %v47_v25 }
  0x8a   :  { %v49_v27 = vsub.f32 1.5, %v48_v26 }
  0x8b   :  { %v200_v28 = vpop.eup %199 }
  0x8c   :  { %v50_v29 = vmul.f32 %v198_v22, %v49_v27  ;;  %v56_v30 = vmul.f32 %v200_v28, %v44_v23  ;;  %vm62_vm5 = vweird.f32 %v200_v28 }
  0x8d   :  { %vm63_vm7 = vmor %vm61_vm6, %vm62_vm5 }
  0x8e   :  { %v54_v32 = vsel %vm53_vm4, %v198_v22, %v50_v29  ;;  %v57_v33 = vmul.f32 %v200_v28, %v56_v30 }
  0x8f   :  { %v65_v34 = vmul.f32 %v54_v32, %v23_v0 }
  0x90   :  { %v58_v35 = vmul.f32 0.5, %v57_v33 }
  0x91   :  { %v71_v36 = vmul.f32 %v194_v31, %v65_v34 }
  0x92   :  { %v59_v37 = vsub.f32 1.5, %v58_v35 }
  0x93   :  { %73 = vst.msk [vmem:[#allocation2] sm:$0xff] %vm27_vm0, %v71_v36 }
  0x94   :  { %75 = vst.msk [vmem:[#allocation5] sm:$0xff] %vm27_vm0, %v71_v36  ;;  %v60_v38 = vmul.f32 %v200_v28, %v59_v37 }
  0x96   :  { %v64_v39 = vsel %vm63_vm7, %v200_v28, %v60_v38 }
  0x97   :  { %v66_v40 = vmul.f32 %v64_v39, %v24_v2 }
  0x99   :  { %v72_v41 = vmul.f32 %v194_v31, %v66_v40 }
  0x9a   :  { %v77_v42 = vld [vmem:[#allocation2] sm:$0xff] }
  0x9b   :  { %74 = vst.msk [vmem:[#allocation2 + $0x8] sm:$0xff] %vm27_vm0, %v72_v41 }
  0x9c   :  { %76 = vst.msk [vmem:[#allocation5 + $0x8] sm:$0xff] %vm27_vm0, %v72_v41 }
  0x9d   :  { %157 = dma.vmem_to_hbm [thread:$0]  %s150_s2, 256, %s152_s30, [#allocation6], %s255_s5, %s255_s5, %s256_s6  }
  0xa2   :  { %v78_v43 = vld [vmem:[#allocation2 + $0x8] sm:$0xff] }
  0xa3   :  { %v79_v44 = vpack.c.bf16 %v78_v43, %v77_v42 }
  0xa5   :  { %184 = vmatmul.msk.bf16.vlgmr.msra.gmra.mxu0 %vm27_vm0, %v79_v44 }
 0x122   :  { %v125_v45 = vpop.f32.mrf.mxu0 }
 0x123   :  { %130 = vst [vmem:[#allocation3] sm:$0xff] %v125_v45 }
 0x12a   :  { %v127_v46 = vpop.f32.mrf.mxu0 }
 0x12b   :  { %131 = vst [vmem:[#allocation3 + $0x8] sm:$0xff] %v127_v46 }
 0x12c   :  { %144 = dma.vmem_to_hbm [thread:$0]  %s137_s8, 256, %s139_s11, [#allocation4], %s255_s5, %s255_s5, %s256_s6  }
 0x12d   :  { %249 = dma.done.wait [#allocation4], 256  }
 0x12e   :  { %250 = vsyncadd [#allocation4], 4294967040 }
 0x12f   :  { %251 = dma.done.wait [#allocation6], 256  }
 0x130   :  { %252 = vsyncadd [#allocation6], 4294967040 }
 0x131   :  { %166 = vsyncpa [#allocation4], 1 }
 0x132   :  { %167 = vsyncpa [#allocation6], 1 }

// kernel: llamba_forward.2
= control target key start
LH: loop header
LB: loop body
LE: loop exit
PB: predicated region body
PF: predicated region fallthrough
CT: control target
= control target key end

     0   :  { %s2560_s17 = smov 0   ;;  %s3154_s0 = inlined_call_operand.vmem [shape: f32[2,8,64], index: 0, kind: input, shape index: {}]   ;;  %s3155_s1 = inlined_call_operand.vmem [shape: f32[2,1,64], index: 1, kind: input, shape index: {}]   ;;  %s3156_s2 = inlined_call_operand.vmem [shape: f32[2,1,64], index: 2, kind: input, shape index: {}]   ;;  %s3157_s3 = inlined_call_operand.vmem [shape: bf16[2,64,384], index: 3, kind: input, shape index: {}]   ;;  %s3158_s4 = inlined_call_operand.vmem [shape: f32[2,4,384], index: 4, kind: input, shape index: {}]   ;;  %s3159_s5 = inlined_call_operand.vmem [shape: f32[2,1,384], index: 5, kind: input, shape index: {}]   ;;  %s3160_s6 = inlined_call_operand.vmem [shape: f32[2,1,64], index: 6, kind: input, shape index: {}]   ;;  %s3161_s7 = inlined_call_operand.vmem [shape: f32[2,1,64], index: 7, kind: input, shape index: {}]   ;;  %s3162_s8 = inlined_call_operand.vmem [shape: bf16[2,64,64], index: 8, kind: input, shape index: {}]   ;;  %s3163_s9 = inlined_call_operand.vmem [shape: bf16[2,64,256], index: 9, kind: input, shape index: {}]   ;;  %s3164_s10 = inlined_call_operand.vmem [shape: bf16[2,128,64], index: 10, kind: input, shape index: {}]   ;;  %s3165_s11 = inlined_call_operand.vmem [shape: f32[2,8,64], index: 11, kind: output, shape index: {}]  }
   0x1 LB: > { %3167 = sst [smem:[#allocation2_spill]] %s2482_s17  ;;  %s2181_s18 = sadd.s32 4294967295, %s2482_s17   ;;  %s2482_s17 = sphi %s2560_s17, %s21_s17  }
   0x2   : > { %p2184_p0 = scmp.ge.s32.totalorder %s2482_s17, 1  ;;  %p413_p1 = scmp.lt.s32.totalorder %s2482_s17, 3 }
   0x4   : > { %p414_p2 = pnand %p2184_p0, %p413_p1 }
   0x5   : > { %p484_p3 = scmp.lt.s32.totalorder (!%p414_p2), %s2181_s18, 1  ;;  %p2193_p4 = scmp.ne.s32.totalorder (!%p414_p2), %s2181_s18, 0 }
   0x6   : > { %417 = sbr.rel (%p414_p2) target bundleno = 2319 (0x90f), region = 64 }
   0xb   : > { %s2568_s19 = scalar_select %p484_p3, %s2181_s18, 1 }
   0xd   : > { %s2384_s26 = smul.u32 96, %s2568_s19  ;;  %s2349_s24 = sshll.u32 %s2568_s19, 5 }
   0xe   : > { %s2385_s30 = smul.u32 12, %s2568_s19  ;;  %s2608_s13 = scalar_lea.vmem %s3162_s8, %s2349_s24 }
   0xf   : > { %s2591_s20 = scalar_lea.vmem %s3157_s3, %s2384_s26  ;;  %s2386_s21 = smul.u32 3, %s2568_s19 }
  0x10   : > { %s2597_s23 = scalar_lea.vmem %s3158_s4, %s2385_s30  ;;  %s2350_s15 = sshll.u32 %s2568_s19, 6 }
  0x11   : > { %s2603_s28 = scalar_lea.vmem %s3159_s5, %s2386_s21  ;;  %s2614_s14 = scalar_lea.vmem %s3163_s9, %s2350_s15 }
  0x12   : > { %s2619_s30 = scalar_lea.vmem %s3164_s10, %s2350_s15  ;;  %529 = sbr.rel (%p2193_p4) target bundleno = 26 (0x1a), region = 68 }
  0x17   : > { %v530_v0 = vld [vmem:[%s3154_s0] sm:$0xff]  ;;  %vm532_vm0 = vcmask 523264   ;;  %v531_v1 = vld [vmem:[%s3154_s0 + $0x8] sm:$0xff] }
  0x18   : > { %533 = vst.msk [vmem:[%s3165_s11] sm:$0xff] %vm532_vm0, %v530_v0 }
  0x19   : > { %534 = vst.msk [vmem:[%s3165_s11 + $0x8] sm:$0xff] %vm532_vm0, %v531_v1 }
  0x1a PF: > { %vm539_vm1 = vcmask 523264   ;;  %v2484_v8 = vmov 64.0   ;;  %v2232_v12 = vld [vmem:[%s2591_s20 + $0x48] sm:$0xf]  ;;  %v2362_v13 = vld [vmem:[%s2591_s20 + $0x50] sm:$0xf0]  ;;  %s3168_s21 = scalar_lea.vmem %s3155_s1, %s2568_s19 }
  0x1b   : > { %2424 = vrcp.f32 %v2484_v8  ;;  %v2361_v14 = vld [vmem:[%s2591_s20 + $0x4c] sm:$0xf]  ;;  %v2233_v15 = vor.u32 %v2362_v13, %v2232_v12  ;;  %v2234_v16 = vld [vmem:[%s2591_s20 + $0x54] sm:$0xf0]  ;;  %v2220_v19 = vld [vmem:[%s2591_s20 + $0x30] sm:$0xf] }
  0x1c   : > { %v2237_v17 = vor.u32 %v2361_v14, %v2234_v16  ;;  %v2359_v20 = vld [vmem:[%s2591_s20 + $0x38] sm:$0xf0]  ;;  %v2358_v21 = vld [vmem:[%s2591_s20 + $0x34] sm:$0xf]  ;;  %v2222_v23 = vld [vmem:[%s2591_s20 + $0x3c] sm:$0xf0] }
  0x1d   : > { %673 = vmatpush.bf16.msra.mxu0 %v2233_v15  ;;  %v2221_v22 = vor.u32 %v2359_v20, %v2220_v19  ;;  %v2225_v24 = vor.u32 %v2358_v21, %v2222_v23  ;;  %v2208_v26 = vld [vmem:[%s2591_s20 + $0x18] sm:$0xf]  ;;  %v2356_v27 = vld [vmem:[%s2591_s20 + $0x20] sm:$0xf0]  ;;  %v2355_v28 = vld [vmem:[%s2591_s20 + $0x1c] sm:$0xf] }
  0x1e   : > { %687 = vmatpush.bf16.msra.mxu2 %v2237_v17  ;;  %v2209_v29 = vor.u32 %v2356_v27, %v2208_v26  ;;  %v2210_v30 = vld [vmem:[%s2591_s20 + $0x24] sm:$0xf0]  ;;  %v2196_v33 = vld [vmem:[%s2591_s20] sm:$0xf]  ;;  %v2353_v34 = vld [vmem:[%s2591_s20 + $0x8] sm:$0xf0] }
  0x1f   : > { %v2636_v2 = vld [vmem:[%s3165_s11] sm:$0xff]  ;;  %v2213_v31 = vor.u32 %v2355_v28, %v2210_v30  ;;  %v2197_v36 = vor.u32 %v2353_v34, %v2196_v33  ;;  %v2198_v37 = vld [vmem:[%s2591_s20 + $0xc] sm:$0xf0]  ;;  %v2363_v43 = vld [vmem:[%s2591_s20 + $0x58] sm:$0xf0]  ;;  %s2487_s29 = smov 16  }
  0x20   : > { %v537_v3 = vmul.f32 %v2636_v2, %v2636_v2  ;;  %v2643_v4 = vld [vmem:[%s3165_s11 + $0x8] sm:$0xff]  ;;  %v2352_v35 = vld [vmem:[%s2591_s20 + $0x4] sm:$0xf]  ;;  %v2240_v42 = vld [vmem:[%s2591_s20 + $0x50] sm:$0xf]  ;;  %s2488_s24 = smov 64  }
  0x21   : > { %v538_v6 = vmul.f32 %v2643_v4, %v2643_v4  ;;  %v2425_v9 = vpop.eup %2424  ;;  %674 = vmatpush.bf16.msra.mxu0 %v2221_v22  ;;  %v2201_v39 = vor.u32 %v2352_v35, %v2198_v37  ;;  %v2241_v44 = vor.u32 %v2363_v43, %v2240_v42  ;;  %v2228_v45 = vld [vmem:[%s2591_s20 + $0x38] sm:$0xf]  ;;  %v2360_v46 = vld [vmem:[%s2591_s20 + $0x40] sm:$0xf0]  ;;  %v2216_v48 = vld [vmem:[%s2591_s20 + $0x20] sm:$0xf] }
  0x22   : > { %v540_v5 = vsel %vm539_vm1, %v537_v3, 0.0  ;;  %v547_v10 = vmul.f32 64.0, %v2425_v9  ;;  %vm551_vm2 = vweird.f32 %v2425_v9  ;;  %688 = vmatpush.bf16.msra.mxu2 %v2225_v24  ;;  %v2229_v47 = vor.u32 %v2360_v46, %v2228_v45  ;;  %v2357_v49 = vld [vmem:[%s2591_s20 + $0x28] sm:$0xf0]  ;;  %v2204_v55 = vld [vmem:[%s2591_s20 + $0x8] sm:$0xf] }
  0x23   : > { %541 = vadd.xlane.f32.xlu0 %v540_v5  ;;  %v543_v7 = vsel %vm539_vm1, %v538_v6, 0.0  ;;  %v2217_v52 = vor.u32 %v2357_v49, %v2216_v48  ;;  %v2354_v56 = vld [vmem:[%s2591_s20 + $0x10] sm:$0xf0]  ;;  %v711_v16 = vld [vmem:[%s2597_s23] sm:$0xff]  ;;  %s2489_s27 = smov 32   ;;  %s2490_s12 = smov 96  }
  0x24   : > { %v548_v11 = vsub.f32 1.0, %v547_v10  ;;  %v2205_v59 = vor.u32 %v2354_v56, %v2204_v55  ;;  %v716_v20 = vperm.slane %v711_v16, 7  ;;  %v754_v22 = vperm.slane %v711_v16, 2  ;;  %s2491_s26 = smov 48   ;;  %s2495_s16 = smov 127  }
  0x25   : > { %675 = vmatpush.bf16.msra.mxu0 %v2209_v29  ;;  %v755_v24 = vperm.slane %v711_v16, 6  ;;  %v797_v26 = vperm.slane %v711_v16, 1  ;;  %vm1005_vm15 = vcmask 1043456   ;;  %vm937_vm0 = vcmask 130048   ;;  %s2496_s18 = smov 126   ;;  %s2497_s15 = smov 125  }
  0x26   : > { %v549_v18 = vmul.f32 %v2425_v9, %v548_v11  ;;  %689 = vmatpush.bf16.msra.mxu2 %v2213_v31  ;;  %v2702_v27 = vperm.slane %v716_v20, 3  ;;  %v2714_v30 = vperm.slane %v754_v22, 2  ;;  %v798_v31 = vperm.slane %v711_v16, 5  ;;  %s3169_s20 = scalar_lea.vmem %s3161_s7, %s2568_s19 }
  0x28   : > { %v550_v25 = vadd.f32 %v2425_v9, %v549_v18  ;;  %v2741_v48 = vperm.slane %v798_v31, 1 }
  0x29   : > { %676 = vmatpush.bf16.msra.mxu0 %v2197_v36  ;;  %v2721_v36 = vperm.slane %v755_v24, 2 }
  0x2a   : > { %v2661_v32 = vsel %vm551_vm2, %v2425_v9, %v550_v25  ;;  %690 = vmatpush.bf16.msra.mxu2 %v2201_v39  ;;  %v2420_v9 = vld [vmem:[%s3168_s21] ss:$0 sm:$0xff] }
  0x2b   : > { %544 = vadd.xlane.f32.xlu0 %v543_v7 }
  0x2e   : > { %701 = vmatpush.bf16.msrb.mxu2 %v2241_v44  ;;  %v841_v44 = vperm.slane %v711_v16, 4 }
  0x32   : > { %702 = vmatpush.bf16.msrb.mxu2 %v2229_v47 }
  0x36   : > { %703 = vmatpush.bf16.msrb.mxu2 %v2217_v52 }
  0x3a   : > { %704 = vmatpush.bf16.msrb.mxu2 %v2205_v59 }
  0x96   : > { %v542_v38 = vpop.xlane.xlu0 %541 }
  0x97   : > { %v553_v40 = vmul.f32 %v2661_v32, %v542_v38  ;;  %v2725_v38 = vperm.slane %v797_v26, 1 }
  0x99   : > { %v555_v41 = vadd.f32 1e-05, %v553_v40 }
  0x9b   : > { %2426 = vrsqrt.f32 %v555_v41  ;;  %vm563_vm4 = vweird.f32 %v555_v41 }
  0x9e   : > { %v545_v50 = vpop.xlane.xlu0 %544 }
  0x9f   : > { %v554_v51 = vmul.f32 %v2661_v32, %v545_v50 }
  0xa1   : > { %v2427_v53 = vpop.eup %2426  ;;  %v556_v54 = vadd.f32 1e-05, %v554_v51 }
  0xa2   : > { %v558_v57 = vmul.f32 %v2427_v53, %v555_v41  ;;  %vm564_vm3 = vweird.f32 %v2427_v53 }
  0xa3   : > { %2428 = vrsqrt.f32 %v556_v54  ;;  %vm565_vm5 = vmor %vm563_vm4, %vm564_vm3  ;;  %vm573_vm7 = vweird.f32 %v556_v54  ;;  %vm908_vm3 = vcmask 64512  }
  0xa4   : > { %v559_v58 = vmul.f32 %v2427_v53, %v558_v57 }
  0xa6   : > { %v560_v60 = vmul.f32 0.5, %v559_v58 }
  0xa8   : > { %v561_v61 = vsub.f32 1.5, %v560_v60  ;;  %v712_v60 = vld [vmem:[%s2597_s23 + $0x8] sm:$0xf]  ;;  %s2485_s23 = smov 80  }
  0xa9   : > { %v2429_v62 = vpop.eup %2428  ;;  %v799_v24 = vperm.slane %v712_v60, 1 }
  0xaa   : > { %v568_v63 = vmul.f32 %v2429_v62, %v556_v54  ;;  %v562_v0 = vmul.f32 %v2427_v53, %v561_v61  ;;  %vm574_vm6 = vweird.f32 %v2429_v62  ;;  %v2774_v61 = vperm.slane %v841_v44, 0 }
  0xab   : > { %vm575_vm8 = vmor %vm573_vm7, %vm574_vm6  ;;  %vm1309_vm7 = vcmask 261120  }
  0xac   : > { %v569_v1 = vmul.f32 %v2429_v62, %v568_v63  ;;  %v566_v5 = vsel %vm565_vm5, %v2427_v53, %v562_v0  ;;  %v840_v53 = vperm.slane %v711_v16, 0 }
  0xad   : > { %v577_v8 = vmul.f32 %v566_v5, %v2636_v2  ;;  %v730_v2 = vlaneseq }
  0xae   : > { %v570_v3 = vmul.f32 0.5, %v569_v1 }
  0xaf   : > { %v583_v12 = vmul.f32 %v2420_v9, %v577_v8  ;;  %v2693_v18 = vshrl.u32 %v730_v2, 7  ;;  %v756_v8 = vperm.slane %v712_v60, 2 }
  0xb0   : > { %v571_v6 = vsub.f32 1.5, %v570_v3 }
  0xb1   : > { %vm738_vm9 = vcmp.lt.s32.totalorder %v2693_v18, 1  ;;  %vm745_vm10 = vcmp.ge.s32.totalorder %v2693_v18, 1  ;;  %vm781_vm11 = vcmp.lt.s32.totalorder %v2693_v18, 2  ;;  %vm788_vm12 = vcmp.ge.s32.totalorder %v2693_v18, 2 }
  0xb2   : > { %v572_v7 = vmul.f32 %v2429_v62, %v571_v6  ;;  %vm824_vm13 = vcmp.lt.s32.totalorder %v2693_v18, 3  ;;  %vm831_vm14 = vcmp.ge.s32.totalorder %v2693_v18, 3  ;;  %v2787_v6 = vperm.slane %v840_v53, 0 }
  0xb3   : > { %v2799_v22 = vperm.slane %v756_v8, 2 }
  0xb4   : > { %v576_v10 = vsel %vm575_vm8, %v2429_v62, %v572_v7  ;;  %v717_v7 = vperm.slane %v712_v60, 3  ;;  %vm1311_vm8 = vcmask 392192  }
  0xb5   : > { %v578_v11 = vmul.f32 %v576_v10, %v2643_v4  ;;  %v715_v4 = vperm.slane %v711_v16, 3 }
  0xb6   : > { %v2797_v20 = vperm.slane %v717_v7, 3 }
  0xb7   : > { %v584_v13 = vmul.f32 %v2420_v9, %v578_v11  ;;  %v2700_v25 = vperm.slane %v715_v4, 3  ;;  %v2790_v9 = vld [vmem:[%s2603_s28] sm:$0x7]  ;;  %s2486_s28 = smov 112  }
  0xb9   : > { %v585_v14 = vpack.c.bf16 %v584_v13, %v583_v12  ;;  %v864_v13 = vperm.slane %v2790_v9, 1 }
  0xbb   : > { %2242 = vmatmul.msk.bf16.vlgmr.msra.gmra.mxu0 %vm539_vm1, %v585_v14  ;;  %2243 = vmatmul.msk.bf16.vlgmr.msra.gmra.mxu2 %vm539_vm1, %v585_v14 }
  0xcb   : > { %2244 = vmatmul.msk.bf16.vlgmr.msrb.gmra.mxu2 %vm539_vm1, %v585_v14 }
 0x138   : > { %v2687_v15 = vpop.f32.mrf.mxu0 }
 0x139   : > { %v732_v23 = vrot.slane %v2687_v15, 7  ;;  %v775_v41 = vrot.slane %v2687_v15, 6  ;;  %v724_v56 = vmul.f32 %v2700_v25, %v2687_v15  ;;  %v818_v57 = vrot.slane %v2687_v15, 5 }
 0x13e   : > { %v2690_v17 = vpop.f32.mrf.mxu2 }
 0x13f   : > { %v733_v33 = vrot.slane %v2690_v17, 7  ;;  %v776_v42 = vrot.slane %v2690_v17, 6  ;;  %v819_v45 = vrot.slane %v2690_v17, 5  ;;  %v725_v58 = vmul.f32 %v2702_v27, %v2690_v17 }
 0x140   : > { %v2695_v19 = vpop.f32.mrf.mxu0 }
 0x141   : > { %v735_v21 = vrot.slane %v2695_v19, 7  ;;  %v778_v34 = vrot.slane %v2695_v19, 6  ;;  %v821_v46 = vrot.slane %v2695_v19, 5 }
 0x143   : > { %v742_v28 = vsel %vm738_vm9, %v735_v21, %v732_v23  ;;  %v785_v50 = vsel %vm781_vm11, %v778_v34, %v775_v41  ;;  %v828_v1 = vsel %vm824_vm13, %v821_v46, %v818_v57  ;;  %v739_v26 = vsel %vm738_vm9, %v732_v23, %v735_v21 }
 0x144   : > { %v748_v37 = vsel %vm745_vm10, %v742_v28, 0.0  ;;  %v791_v62 = vsel %vm788_vm12, %v785_v50, 0.0  ;;  %v834_v14 = vsel %vm831_vm14, %v828_v1, 0.0  ;;  %v863_v21 = vperm.slane %v2790_v9, 0 }
 0x145   : > { %v763_v49 = vmul.f32 %v2714_v30, %v748_v37  ;;  %v806_v10 = vmul.f32 %v2725_v38, %v791_v62  ;;  %v849_v28 = vmul.f32 %v2787_v6, %v834_v14  ;;  %v842_v37 = vperm.slane %v712_v60, 0 }
 0x146   : > { %v2712_v29 = vpop.f32.mrf.mxu2  ;;  %v751_v53 = vsel %vm745_vm10, %v739_v26, 0.0 }
 0x147   : > { %v736_v35 = vrot.slane %v2712_v29, 7  ;;  %v779_v39 = vrot.slane %v2712_v29, 6  ;;  %v822_v40 = vrot.slane %v2712_v29, 5  ;;  %v769_v0 = vadd.f32 %v763_v49, %v724_v56 }
 0x148   : > { %v805_v56 = vperm.slane %v799_v24, 1  ;;  %v848_v1 = vperm.slane %v842_v37, 0 }
 0x149   : > { %v743_v43 = vsel %vm738_vm9, %v736_v35, %v733_v33  ;;  %v786_v52 = vsel %vm781_vm11, %v779_v39, %v776_v42  ;;  %v829_v55 = vsel %vm824_vm13, %v822_v40, %v819_v45  ;;  %v812_v16 = vadd.f32 %v806_v10, %v769_v0 }
 0x14a   : > { %v749_v47 = vsel %vm745_vm10, %v743_v43, 0.0  ;;  %v792_v54 = vsel %vm788_vm12, %v786_v52, 0.0  ;;  %v835_v63 = vsel %vm831_vm14, %v829_v55, 0.0 }
 0x14b   : > { %v764_v51 = vmul.f32 %v2721_v36, %v749_v47  ;;  %v807_v3 = vmul.f32 %v2741_v48, %v792_v54  ;;  %v850_v12 = vmul.f32 %v2774_v61, %v835_v63 }
 0x14d   : > { %v770_v5 = vadd.f32 %v764_v51, %v725_v58  ;;  %v855_v51 = vadd.f32 %v849_v28, %v812_v16 }
 0x14e   : > { %v2771_v59 = vpop.f32.mrf.mxu2 }
 0x14f   : > { %v813_v11 = vadd.f32 %v807_v3, %v770_v5  ;;  %v734_v44 = vrot.slane %v2771_v59, 7  ;;  %v777_v47 = vrot.slane %v2771_v59, 6  ;;  %v820_v58 = vrot.slane %v2771_v59, 5 }
 0x150   : > { %v726_v63 = vmul.f32 %v2797_v20, %v2771_v59  ;;  %v766_v3 = vmul.f32 %v2714_v30, %v751_v53  ;;  %v782_v5 = vsel %vm781_vm11, %v775_v41, %v778_v34  ;;  %v2847_v8 = vadd.f32 %v863_v21, %v855_v51 }
 0x151   : > { %v856_v4 = vadd.f32 %v850_v12, %v813_v11  ;;  %v727_v30 = vmul.f32 %v2700_v25, %v2695_v19  ;;  %v794_v12 = vsel %vm788_vm12, %v782_v5, 0.0  ;;  %v865_v34 = vperm.slane %v2790_v9, 2 }
 0x152   : > { %v2864_v24 = vpack.c.bf16 %v2847_v8, %v2847_v8  ;;  %v809_v26 = vmul.f32 %v2725_v38, %v794_v12 }
 0x153   : > { %v870_v43 = vadd.f32 %v864_v13, %v856_v4  ;;  %v772_v41 = vadd.f32 %v766_v3, %v727_v30  ;;  %v825_v4 = vsel %vm824_vm13, %v818_v57, %v821_v46  ;;  %v783_v3 = vsel %vm781_vm11, %v776_v42, %v779_v39 }
 0x154   : > { %v837_v15 = vsel %vm831_vm14, %v825_v4, 0.0  ;;  %v795_v5 = vsel %vm788_vm12, %v783_v3, 0.0  ;;  %v826_v39 = vsel %vm824_vm13, %v819_v45, %v822_v40 }
 0x155   : > { %v2818_v23 = vpack.c.bf16 %v870_v43, %v870_v43  ;;  %v815_v46 = vadd.f32 %v809_v26, %v772_v41  ;;  %v852_v28 = vmul.f32 %v2787_v6, %v837_v15 }
 0x156   : > { %v2808_v31 = vpop.f32.mrf.mxu2 }
 0x157   : > { %v737_v49 = vrot.slane %v2808_v31, 7  ;;  %v780_v50 = vrot.slane %v2808_v31, 6  ;;  %v823_v52 = vrot.slane %v2808_v31, 5  ;;  %1205 = vrot.lane.b32.xlu0 %v2818_v23, %s2485_s23  ;;  %1023 = vrot.lane.b32.xlu2 %v2818_v23, %s2486_s28  ;;  %v858_v43 = vadd.f32 %v852_v28, %v815_v46 }
 0x159   : > { %v744_v54 = vsel %vm738_vm9, %v737_v49, %v734_v44  ;;  %v787_v55 = vsel %vm781_vm11, %v780_v50, %v777_v47  ;;  %v830_v7 = vsel %vm824_vm13, %v823_v52, %v820_v58  ;;  %v741_v38 = vsel %vm738_vm9, %v734_v44, %v737_v49 }
 0x15a   : > { %v750_v60 = vsel %vm745_vm10, %v744_v54, 0.0  ;;  %v793_v62 = vsel %vm788_vm12, %v787_v55, 0.0  ;;  %v836_v59 = vsel %vm831_vm14, %v830_v7, 0.0  ;;  %v753_v53 = vsel %vm745_vm10, %v741_v38, 0.0 }
 0x15b   : > { %v765_v0 = vmul.f32 %v2799_v22, %v750_v60  ;;  %v808_v10 = vmul.f32 %v805_v56, %v793_v62  ;;  %v851_v16 = vmul.f32 %v848_v1, %v836_v59  ;;  %v2885_v54 = vadd.f32 %v863_v21, %v858_v43 }
 0x15c   : > { %v768_v6 = vmul.f32 %v2799_v22, %v753_v53  ;;  %v784_v55 = vsel %vm781_vm11, %v777_v47, %v780_v50  ;;  %v729_v44 = vmul.f32 %v2797_v20, %v2808_v31  ;;  %v827_v21 = vsel %vm824_vm13, %v820_v58, %v823_v52 }
 0x15d   : > { %v771_v11 = vadd.f32 %v765_v0, %v726_v63  ;;  %v2894_v49 = vpack.c.bf16 %v2885_v54, %v2885_v54  ;;  %v796_v62 = vsel %vm788_vm12, %v784_v55, 0.0  ;;  %v740_v22 = vsel %vm738_vm9, %v733_v33, %v736_v35 }
 0x15e   : > { %v774_v63 = vadd.f32 %v768_v6, %v729_v44  ;;  %v811_v31 = vmul.f32 %v805_v56, %v796_v62  ;;  %v839_v47 = vsel %vm831_vm14, %v827_v21, 0.0  ;;  %v752_v50 = vsel %vm745_vm10, %v740_v22, 0.0 }
 0x15f   : > { %v814_v14 = vadd.f32 %v808_v10, %v771_v11  ;;  %1275 = vrot.lane.b32.xlu0 %v2864_v24, %s2485_s23  ;;  %1207 = vrot.lane.b32.xlu2 %v2864_v24, %s2487_s29  ;;  %v854_v58 = vmul.f32 %v848_v1, %v839_v47  ;;  %v767_v0 = vmul.f32 %v2721_v36, %v752_v50  ;;  %v894_v53 = vand.u32 127, %v730_v2 }
 0x160   : > { %v817_v52 = vadd.f32 %v811_v31, %v774_v63  ;;  %v728_v56 = vmul.f32 %v2702_v27, %v2712_v29  ;;  %v810_v59 = vmul.f32 %v2741_v48, %v795_v5  ;;  %v838_v27 = vsel %vm831_vm14, %v826_v39, 0.0 }
 0x161   : > { %v857_v25 = vadd.f32 %v851_v16, %v814_v14  ;;  %v853_v29 = vmul.f32 %v2774_v61, %v838_v27  ;;  %vm895_vm2 = vcmp.ge.s32.totalorder %v2693_v18, %v894_v53  ;;  %v2492_v55 = vmov 0.0  }
 0x162   : > { %v860_v35 = vadd.f32 %v854_v58, %v817_v52  ;;  %v773_v7 = vadd.f32 %v767_v0, %v728_v56  ;;  %v2966_v44 = vsel %vm895_vm2, 1.0, %v2492_v55  ;;  %v1007_v2 = vsel %vm1005_vm15, %v2864_v24, 0 }
 0x163   : > { %v2873_v19 = vadd.f32 %v865_v34, %v857_v25 }
 0x164   : > { %v2936_v10 = vadd.f32 %v865_v34, %v860_v35  ;;  %v816_v11 = vadd.f32 %v810_v59, %v773_v7  ;;  %v2494_v35 = vmov 0   ;;  %v2498_v59 = vmov 3  }
 0x165   : > { %v877_v57 = vand.u32 2147483647, %v2873_v19  ;;  %v875_v36 = vmax.f32 %v2873_v19, 0.0  ;;  %2413 = vset.pattern.permute.xlu0 %v2494_v35 }
 0x166   : > { %v878_v17 = vand.u32 2147483647, %v2936_v10  ;;  %v859_v40 = vadd.f32 %v853_v29, %v816_v11  ;;  %v2499_v11 = vmov 2  }
 0x167   : > { %v879_v37 = vsub.f32 0.0, %v877_v57  ;;  %935 = vrot.lane.b32.xlu0 %v2864_v24, %s2488_s24  ;;  %1093 = vrot.lane.b32.xlu2 %v2864_v24, %s2486_s28 }
 0x168   : > { %v880_v45 = vsub.f32 0.0, %v878_v17  ;;  %v873_v48 = vadd.f32 %v864_v13, %v859_v40  ;;  %v876_v13 = vmax.f32 %v2936_v10, 0.0 }
 0x169   : > { %v881_v51 = vmul.f32 1.442695, %v879_v37 }
 0x16a   : > { %v883_v30 = vmul.f32 1.442695, %v880_v45  ;;  %v1338_v12 = vpack.c.bf16 %v873_v48, %v873_v48 }
 0x16b   : > { %2430 = vpow2.f32 %v881_v51 }
 0x16f   : > { %1116 = vrot.lane.b32.xlu0 %v2864_v24, %s2489_s27  ;;  %1340 = vrot.lane.b32.xlu2 %v2894_v49, %s2488_s24 }
 0x171   : > { %v2431_v60 = vpop.eup %2430 }
 0x172   : > { %v885_v20 = vadd.f32 1.0, %v2431_v60 }
 0x174   : > { %2432 = vlog2.f32 %v885_v20 }
 0x175   : > { %2434 = vpow2.f32 %v883_v30 }
 0x177   : > { %1114 = vrot.lane.b32.xlu0 %v2818_v23, %s2490_s12  ;;  %1184 = vrot.lane.b32.xlu2 %v2864_v24, %s2490_s12 }
 0x17a   : > { %v2433_v33 = vpop.eup %2432 }
 0x17b   : > { %v888_v1 = vmul.f32 0.6931472, %v2433_v33  ;;  %v2435_v14 = vpop.eup %2434  ;;  %v2493_v33 = vmov 1  }
 0x17c   : > { %v886_v61 = vadd.f32 1.0, %v2435_v14  ;;  %2411 = vset.pattern.permute.xlu1 %v2493_v33 }
 0x17d   : > { %v891_v42 = vadd.f32 %v888_v1, %v875_v36 }
 0x17e   : > { %2436 = vlog2.f32 %v886_v61 }
 0x17f   : > { %905 = vrot.lane.b32.xlu1 %v891_v42, %s2488_s24  ;;  %1428 = vrot.lane.b32.xlu0 %v2894_v49, %s2491_s26 }
 0x184   : > { %v2437_v16 = vpop.eup %2436 }
 0x185   : > { %v890_v9 = vmul.f32 0.6931472, %v2437_v16 }
 0x187   : > { %1025 = vrot.lane.b32.xlu1 %v2864_v24, %s2491_s26  ;;  %1519 = vrot.lane.b32.xlu0 %v2894_v49, %s2489_s27  ;;  %v892_v34 = vadd.f32 %v890_v9, %v876_v13 }
 0x18f   : > { %1517 = vrot.lane.b32.xlu1 %v1338_v12, %s2490_s12  ;;  %1426 = vrot.lane.b32.xlu0 %v1338_v12, %s2486_s28 }
 0x197   : > { %1610 = vrot.lane.b32.xlu0 %v2894_v49, %s2487_s29 }
 0x19f   : > { %1608 = vrot.lane.b32.xlu0 %v1338_v12, %s2485_s23 }
 0x1a7   : > { %1314 = vrot.lane.b32.xlu0 %v892_v34, %s2488_s24 }
 0x1b1   : > { %v1024_v41 = vpop.permute.xlu2 %1023 }
 0x1b9   : > { %v1208_v4 = vpop.permute.xlu2 %1207 }
 0x1ba   : > { %v1213_v22 = vsel %vm937_vm0, %v1208_v4, 0 }
 0x1c1   : > { %v1094_v25 = vpop.permute.xlu2 %1093 }
 0x1c2   : > { %v1099_v26 = vsel %vm1005_vm15, %v1094_v25, 0 }
 0x1c3   : > { %1108 = vmatpush.bf16.msra.mxu1 %v1099_v26 }
 0x1c9   : > { %v1206_v15 = vpop.permute.xlu0 %1205  ;;  %v1341_v37 = vpop.permute.xlu2 %1340 }
 0x1ca   : > { %v1346_v51 = vsel %vm937_vm0, %v1341_v37, 0 }
 0x1d1   : > { %v1276_v46 = vpop.permute.xlu0 %1275  ;;  %v1185_v21 = vpop.permute.xlu2 %1184 }
 0x1d2   : > { %v1281_v57 = vsel %vm1005_vm15, %v1276_v46, 0  ;;  %v1190_v31 = vsel %vm1005_vm15, %v1185_v21, 0 }
 0x1d3   : > { %1290 = vmatpush.bf16.msrb.mxu1 %v1281_v57 }
 0x1d9   : > { %v936_v28 = vpop.permute.xlu0 %935 }
 0x1da   : > { %v942_v62 = vsel %vm937_vm0, %v936_v28, 0 }
 0x1e1   : > { %v1117_v43 = vpop.permute.xlu0 %1116 }
 0x1e2   : > { %v1122_v38 = vsel %vm937_vm0, %v1117_v43, 0 }
 0x1e3   : > { %1131 = vmatpush.bf16.xpose.msra.mxu2 %v1122_v38 }
 0x1e9   : > { %v1115_v6 = vpop.permute.xlu0 %1114 }
 0x1ea   : > { %2251 = vmatmul.msk.bf16.vlgmr.msra.gmra.mxu2 %vm937_vm0, %v1115_v6 }
 0x1eb   : > { %1355 = vmatpush.bf16.xpose.msrb.mxu2 %v1346_v51  ;;  %v1410_v51 = vsel %vm1005_vm15, %v2894_v49, 0 }
 0x1f1   : > { %v906_v60 = vpop.permute.xlu1 %905  ;;  %v1429_v63 = vpop.permute.xlu0 %1428 }
 0x1f2   : > { %927 = vmatpush.msra.mxu3 %v906_v60  ;;  %v1434_v24 = vsel %vm937_vm0, %v1429_v63, 0 }
 0x1f3   : > { %2246 = vmatmul.msk.f32.vlgmr.msra.gmra.mxu3 %vm908_vm3, %v2966_v44 }
 0x1f4   : > { %951 = vmatpush.bf16.xpose.msrb.mxu3 %v942_v62 }
 0x1f9   : > { %v1026_v20 = vpop.permute.xlu1 %1025  ;;  %v1520_v47 = vpop.permute.xlu0 %1519 }
 0x1fa   : > { %v1031_v18 = vsel %vm937_vm0, %v1026_v20, 0  ;;  %v1525_v50 = vsel %vm937_vm0, %v1520_v47, 0  ;;  %2256 = vmatmul.msk.bf16.vlgmr.msrb.gmra.mxu2 %vm937_vm0, %v1338_v12 }
 0x1fb   : > { %2247 = vmatmul.msk.bf16.vlgmr.msrb.gmra.mxu3 %vm937_vm0, %v2818_v23  ;;  %1040 = vmatpush.bf16.xpose.msrb.mxu0 %v1031_v18 }
 0x1fc   : > { %1016 = vmatpush.bf16.msra.mxu3 %v1007_v2  ;;  %1534 = vmatpush.bf16.xpose.msra.mxu2 %v1525_v50 }
 0x200   : > { %1199 = vmatpush.bf16.msrb.mxu3 %v1190_v31 }
 0x201   : > { %v1427_v52 = vpop.permute.xlu0 %1426  ;;  %v1518_v58 = vpop.permute.xlu1 %1517 }
 0x202   : > { %2249 = vmatmul.msk.bf16.vlgmr.msrb.gmra.mxu0 %vm937_vm0, %v1024_v41 }
 0x203   : > { %1222 = vmatpush.bf16.xpose.msra.mxu0 %v1213_v22 }
 0x209   : > { %v1611_v0 = vpop.permute.xlu0 %1610 }
 0x20a   : > { %2260 = vmatmul.msk.bf16.vlgmr.msra.gmra.mxu2 %vm937_vm0, %v1518_v58  ;;  %v1616_v23 = vsel %vm937_vm0, %v1611_v0, 0 }
 0x20b   : > { %1443 = vmatpush.bf16.xpose.msrb.mxu0 %v1434_v24 }
 0x211   : > { %v1609_v3 = vpop.permute.xlu0 %1608 }
 0x212   : > { %2253 = vmatmul.msk.bf16.vlgmr.msra.gmra.mxu0 %vm937_vm0, %v1206_v15 }
 0x213   : > { %1625 = vmatpush.bf16.xpose.msra.mxu0 %v1616_v23 }
 0x219   : > { %v1315_v13 = vpop.permute.xlu0 %1314 }
 0x222   : > { %2258 = vmatmul.msk.bf16.vlgmr.msrb.gmra.mxu0 %vm937_vm0, %v1427_v52 }
 0x232   : > { %2262 = vmatmul.msk.bf16.vlgmr.msra.gmra.mxu0 %vm937_vm0, %v1609_v3 }
 0x26d   : > { %v2987_v56 = vpop.f32.mrf.mxu2 }
 0x275   : > { %v1135_v1 = vpop.f32.mrf.mxu2 }
 0x276   : > { %v929_v36 = vpop.f32.mrf.mxu3 }
 0x277   : > { %1046 = vrot.lane.b32.xlu1 %v929_v36, %s2495_s16  ;;  %1137 = vrot.lane.b32.xlu0 %v929_v36, %s2496_s18 }
 0x278   : > { %1228 = vrot.lane.b32.xlu2 %v929_v36, %s2497_s15 }
 0x27d   : > { %v2992_v39 = vpop.f32.mrf.mxu2 }
 0x27e   : > { %v953_v5 = vpop.f32.mrf.mxu3 }
 0x27f   : > { %1083 = vperm.xlu1 %2411, %v929_v36   ;;  %v1042_v7 = vpop.f32.mrf.mxu0  ;;  %992 = vperm.xlu0 %2413, %v929_v36  }
 0x285   : > { %v1359_v17 = vpop.f32.mrf.mxu2 }
 0x286   : > { %v955_v42 = vpop.f32.mrf.mxu3 }
 0x287   : > { %2412 = vset.pattern.permute.xlu1 %v2498_v59  ;;  %v1044_v27 = vpop.f32.mrf.mxu0  ;;  %2414 = vset.pattern.permute.xlu0 %v2499_v11 }
 0x288   : > { %1265 = vperm.xlu1 %2412, %v929_v36   ;;  %1174 = vperm.xlu0 %2414, %v929_v36  }
 0x28d   : > { %v2996_v40 = vpop.f32.mrf.mxu2 }
 0x28f   : > { %v1224_v29 = vpop.f32.mrf.mxu0 }
 0x295   : > { %v1538_v48 = vpop.f32.mrf.mxu2 }
 0x297   : > { %v1226_v45 = vpop.f32.mrf.mxu0 }
 0x29f   : > { %v2998_v30 = vpop.f32.mrf.mxu0 }
 0x2a7   : > { %v1447_v12 = vpop.f32.mrf.mxu0 }
 0x2aa   : > { %957 = vxpose.xlu0.b32.start.end [1/1] (short) (narrow) %v929_v36, 8 }
 0x2af   : > { %v3000_v14 = vpop.f32.mrf.mxu0 }
 0x2b7   : > { %v1629_v61 = vpop.f32.mrf.mxu0 }
 0x2d2   : > { %v1229_v16 = vpop.permute.xlu2 %1228 }
 0x2d3   : > { %1231 = vxpose.xlu1.b32.start.end [1/1] (short) (narrow) %v1229_v16, 8 }
 0x2e9   : > { %v1047_v9 = vpop.permute.xlu1 %1046  ;;  %v1138_v34 = vpop.permute.xlu0 %1137 }
 0x2ea   : > { %1049 = vxpose.xlu2.b32.start.end [1/1] (short) (narrow) %v1047_v9, 8 }
 0x2f1   : > { %v993_v41 = vpop.permute.xlu0 %992  ;;  %v1084_v53 = vpop.permute.xlu1 %1083 }
 0x2fa   : > { %v1175_v4 = vpop.permute.xlu0 %1174  ;;  %v1266_v6 = vpop.permute.xlu1 %1265 }
 0x311   : > { %2415 = vset.pattern.permute.xlu0 %v2494_v35 }
 0x32d   : > { %1496 = vrot.lane.b32.xlu1 %v2894_v49, %s2486_s28 }
 0x34c   : > { %2416 = vset.pattern.permute.xlu2 %v2493_v33 }
 0x34e   : > { %v973_v25 = vpop.trf.xlu0 }
 0x34f   : > { %v989_v26 = vperm.slane %v973_v25, 0 }
 0x351   : > { %v995_v15 = vsub.f32 %v989_v26, %v993_v41 }
 0x353   : > { %v996_v46 = vmin.f32 %v995_v15, 0.0 }
 0x355   : > { %v997_v57 = vmul.f32 1.442695, %v996_v46 }
 0x357   : > { %2438 = vpow2.f32 %v997_v57 }
 0x35d   : > { %v2439_v28 = vpop.eup %2438 }
 0x35e   : > { %v999_v37 = vmul.f32 %v2439_v28, %v2966_v44 }
 0x360   : > { %v1000_v43 = vmul.f32 %v999_v37, %v953_v5 }
 0x362   : > { %1140 = vxpose.xlu1.b32.start.end [1/1] (short) (narrow) %v1138_v34, 8  ;;  %v1001_v38 = vpack.c.bf16 %v1000_v43, %v1000_v43 }
 0x364   : > { %2248 = vmatmul.msk.bf16.vlgmr.msra.gmra.mxu3 %vm908_vm3, %v1001_v38 }
 0x365   : > { %1419 = vmatpush.bf16.msra.mxu3 %v1410_v51 }
 0x377   : > { %v1247_v55 = vpop.trf.xlu1 }
 0x378   : > { %v1263_v63 = vperm.slane %v1247_v55, 0 }
 0x37a   : > { %v1268_v20 = vsub.f32 %v1263_v63, %v1266_v6 }
 0x37c   : > { %v1269_v22 = vmin.f32 %v1268_v20, 0.0 }
 0x37e   : > { %v1270_v47 = vmul.f32 1.442695, %v1269_v22 }
 0x383   : > { %v1065_v60 = vpop.trf.xlu2 }
 0x384   : > { %v1081_v62 = vperm.slane %v1065_v60, 0 }
 0x386   : > { %v1086_v2 = vsub.f32 %v1081_v62, %v1084_v53 }
 0x388   : > { %v1087_v21 = vmin.f32 %v1086_v2, 0.0 }
 0x38a   : > { %v1088_v18 = vmul.f32 1.442695, %v1087_v21 }
 0x38c   : > { %2440 = vpow2.f32 %v1088_v18 }
 0x38d   : > { %2442 = vpow2.f32 %v1270_v47 }
 0x392   : > { %v2441_v31 = vpop.eup %2440 }
 0x393   : > { %v1090_v50 = vmul.f32 %v2441_v31, %v2966_v44  ;;  %v2443_v58 = vpop.eup %2442  ;;  %v3046_v31 = vld [vmem:[%s3169_s20] ss:$0 sm:$0xff] }
 0x394   : > { %v1272_v0 = vmul.f32 %v2443_v58, %v2966_v44 }
 0x395   : > { %v1091_v24 = vmul.f32 %v1090_v50, %v1042_v7  ;;  %v1720_v50 = vadd.f32 %v3046_v31, %v2873_v19 }
 0x396   : > { %v1273_v23 = vmul.f32 %v1272_v0, %v1224_v29 }
 0x397   : > { %v1092_v52 = vpack.c.bf16 %v1091_v24, %v1091_v24  ;;  %v1722_v24 = vsub.f32 0.0, %v1720_v50 }
 0x398   : > { %v1274_v33 = vpack.c.bf16 %v1273_v23, %v1273_v23 }
 0x399   : > { %2250 = vmatmul.msk.bf16.vlgmr.msra.gmra.mxu1 %vm908_vm3, %v1092_v52  ;;  %v1724_v0 = vmul.f32 1.442695, %v1722_v24 }
 0x39a   : > { %1332 = vmatpush.msra.mxu1 %v1315_v13 }
 0x39f   : > { %v1497_v3 = vpop.permute.xlu1 %1496 }
 0x3a0   : > { %v1502_v35 = vsel %vm1005_vm15, %v1497_v3, 0 }
 0x3a9   : > { %2254 = vmatmul.msk.bf16.vlgmr.msrb.gmra.mxu1 %vm908_vm3, %v1274_v33 }
 0x3aa   : > { %1511 = vmatpush.bf16.msrb.mxu1 %v1502_v35 }
 0x3b9   : > { %2255 = vmatmul.msk.f32.vlgmr.msra.gmra.mxu1 %vm908_vm3, %v2966_v44 }
 0x3e7   : > { %v3015_v36 = vpop.f32.mrf.mxu3 }
 0x3ef   : > { %v1020_v1 = vpop.f32.mrf.mxu3 }
 0x406   : > { %v1156_v5 = vpop.trf.xlu1 }
 0x407   : > { %v1172_v7 = vperm.slane %v1156_v5, 0 }
 0x409   : > { %v1177_v42 = vsub.f32 %v1172_v7, %v1175_v4 }
 0x40b   : > { %v1178_v27 = vmin.f32 %v1177_v42, 0.0 }
 0x40d   : > { %v1179_v17 = vmul.f32 1.442695, %v1178_v27 }
 0x40f   : > { %2444 = vpow2.f32 %v1179_v17 }
 0x415   : > { %v2445_v29 = vpop.eup %2444 }
 0x416   : > { %v1181_v45 = vmul.f32 %v2445_v29, %v2966_v44  ;;  %v1110_v48 = vpop.f32.mrf.mxu1 }
 0x418   : > { %v1182_v12 = vmul.f32 %v1181_v45, %v2987_v56 }
 0x41a   : > { %v1183_v61 = vpack.c.bf16 %v1182_v12, %v1182_v12 }
 0x41c   : > { %2252 = vmatmul.msk.bf16.vlgmr.msrb.gmra.mxu3 %vm908_vm3, %v1183_v61 }
 0x41e   : > { %v1112_v16 = vpop.f32.mrf.mxu1 }
 0x426   : > { %v1292_v9 = vpop.f32.mrf.mxu1 }
 0x42e   : > { %v1294_v13 = vpop.f32.mrf.mxu1 }
 0x436   : > { %v1334_v34 = vpop.f32.mrf.mxu1 }
 0x437   : > { %1396 = vperm.xlu0 %2415, %v1334_v34   ;;  %1540 = vrot.lane.b32.xlu1 %v1334_v34, %s2496_s18 }
 0x438   : > { %1449 = vrot.lane.b32.xlu2 %v1334_v34, %s2495_s16 }
 0x440   : > { %1631 = vrot.lane.b32.xlu2 %v1334_v34, %s2497_s15 }
 0x448   : > { %1486 = vperm.xlu2 %2416, %v1334_v34  }
 0x450   : > { %2417 = vset.pattern.permute.xlu2 %v2499_v11 }
 0x451   : > { %1577 = vperm.xlu2 %2417, %v1334_v34  }
 0x477   : > { %1361 = vxpose.xlu2.b32.start.end [1/1] (short) (narrow) %v1334_v34, 8 }
 0x492   : > { %v1450_v56 = vpop.permute.xlu2 %1449 }
 0x493   : > { %1452 = vxpose.xlu0.b32.start.end [1/1] (short) (narrow) %v1450_v56, 8 }
 0x49a   : > { %v1632_v26 = vpop.permute.xlu2 %1631 }
 0x49f   : > { %v1201_v41 = vpop.f32.mrf.mxu3 }
 0x4a2   : > { %v1487_v15 = vpop.permute.xlu2 %1486 }
 0x4a7   : > { %v1203_v4 = vpop.f32.mrf.mxu3 }
 0x4a9   : > { %v1541_v25 = vpop.permute.xlu1 %1540  ;;  %v1397_v28 = vpop.permute.xlu0 %1396 }
 0x4aa   : > { %1543 = vxpose.xlu1.b32.start.end [1/1] (short) (narrow) %v1541_v25, 8 }
 0x4ab   : > { %v1578_v11 = vpop.permute.xlu2 %1577 }
 0x4d9   : > { %2418 = vset.pattern.permute.xlu2 %v2498_v59 }
 0x4e0   : > { %1668 = vperm.xlu2 %2418, %v1334_v34  }
 0x4e8   : > { %1678 = vrot.lane.b32.xlu2 %v2894_v49, %s2485_s23  ;;  %s3170_s23 = scalar_lea.vmem %s3160_s6, %s2568_s19 }
 0x4fa   : > { %2419 = vset.pattern.permute.xlu0 %v2498_v59 }
 0x501   : > { %1587 = vrot.lane.b32.xlu0 %v2894_v49, %s2490_s12  ;;  %s3171_s12 = scalar_lea.vmem %s3156_s2, %s2568_s19 }
 0x504   : > { %1297 = vrot.lane.b32.xlu1 %v1110_v48, %s2487_s29 }
 0x509   : > { %1301 = vrot.lane.b32.xlu0 %v1201_v41, %s2489_s27 }
 0x50e   : > { %1634 = vxpose.xlu2.b32.start.end [1/1] (short) (narrow) %v1632_v26, 8 }
 0x510   : > { %v1377_v46 = vpop.trf.xlu2 }
 0x511   : > { %v1393_v57 = vperm.slane %v1377_v46, 0  ;;  %1305 = vrot.lane.b32.xlu0 %v1292_v9, %s2491_s26 }
 0x513   : > { %v1399_v37 = vsub.f32 %v1393_v57, %v1397_v28 }
 0x515   : > { %v1400_v43 = vmin.f32 %v1399_v37, 0.0 }
 0x517   : > { %v1401_v38 = vmul.f32 1.442695, %v1400_v43 }
 0x519   : > { %2446 = vpow2.f32 %v1401_v38 }
 0x51f   : > { %v2447_v59 = vpop.eup %2446 }
 0x520   : > { %v1403_v51 = vmul.f32 %v2447_v59, %v2966_v44 }
 0x522   : > { %v1404_v49 = vmul.f32 %v1403_v51, %v2992_v39 }
 0x524   : > { %v1405_v53 = vpack.c.bf16 %v1404_v49, %v1404_v49 }
 0x526   : > { %2257 = vmatmul.msk.bf16.vlgmr.msra.gmra.mxu3 %vm908_vm3, %v1405_v53 }
 0x537   : > { %v1468_v6 = vpop.trf.xlu0 }
 0x538   : > { %v1484_v55 = vperm.slane %v1468_v6, 0 }
 0x53a   : > { %v1489_v60 = vsub.f32 %v1484_v55, %v1487_v15  ;;  %v3036_v62 = vpop.permute.xlu2 %1668 }
 0x53c   : > { %v1490_v63 = vmin.f32 %v1489_v60, 0.0 }
 0x53e   : > { %v1491_v2 = vmul.f32 1.442695, %v1490_v63 }
 0x540   : > { %2448 = vpow2.f32 %v1491_v2 }
 0x541   : > { %2450 = vpow2.f32 %v1724_v0 }
 0x542   : > { %v1679_v21 = vpop.permute.xlu2 %1678 }
 0x543   : > { %v1684_v20 = vsel %vm1005_vm15, %v1679_v21, 0 }
 0x544   : > { %1693 = vmatpush.bf16.msra.mxu1 %v1684_v20 }
 0x546   : > { %v2449_v18 = vpop.eup %2448 }
 0x547   : > { %v1493_v22 = vmul.f32 %v2449_v18, %v2966_v44  ;;  %v2365_v18 = vld [vmem:[%s2608_s13 + $0x8] sm:$0xff] }
 0x549   : > { %v1494_v39 = vmul.f32 %v1493_v22, %v2998_v30  ;;  %v2451_v30 = vpop.eup %2450  ;;  %v1721_v22 = vadd.f32 %v3046_v31, %v2936_v10 }
 0x54a   : > { %v1728_v35 = vadd.f32 1.0, %v2451_v30 }
 0x54b   : > { %v1495_v47 = vpack.c.bf16 %v1494_v39, %v1494_v39  ;;  %v1723_v39 = vsub.f32 0.0, %v1721_v22 }
 0x54c   : > { %v1741_v16 = vand.u32 2147483648, %v1728_v35  ;;  %vm1735_vm5 = vweird.f32 %v1728_v35  ;;  %v1739_v9 = vand.u32 2147483647, %v1728_v35 }
 0x54d   : > { %2259 = vmatmul.msk.bf16.vlgmr.msrb.gmra.mxu1 %vm908_vm3, %v1495_v47  ;;  %v1726_v47 = vmul.f32 1.442695, %v1723_v39 }
 0x54e   : > { %v1559_v52 = vpop.trf.xlu1  ;;  %v1742_v56 = vor.u32 1.1754944e-38, %v1741_v16  ;;  %vm1740_vm9 = vcmp.eq.f32.partialorder %v1739_v9, 8.507059e+37  ;;  %v2474_v9 = vld [vmem:[%s3165_s11] sm:$0xff] }
 0x54f   : > { %v1575_v58 = vperm.slane %v1559_v52, 0  ;;  %v2364_v52 = vld [vmem:[%s2608_s13] sm:$0xff] }
 0x551   : > { %v1580_v23 = vsub.f32 %v1575_v58, %v1578_v11 }
 0x553   : > { %v1581_v3 = vmin.f32 %v1580_v23, 0.0 }
 0x555   : > { %v1582_v33 = vmul.f32 1.442695, %v1581_v3 }
 0x557   : > { %2452 = vpow2.f32 %v1582_v33 }
 0x558   : > { %2454 = vrcp.f32 %v1728_v35 }
 0x55d   : > { %v2453_v1 = vpop.eup %2452 }
 0x55e   : > { %v2455_v5 = vpop.eup %2454  ;;  %v1584_v7 = vmul.f32 %v2453_v1, %v2966_v44 }
 0x55f   : > { %v1731_v42 = vmul.f32 %v2455_v5, %v1728_v35  ;;  %vm1736_vm4 = vweird.f32 %v2455_v5 }
 0x560   : > { %v1585_v27 = vmul.f32 %v1584_v7, %v2996_v40  ;;  %vm1737_vm6 = vmor %vm1735_vm5, %vm1736_vm4  ;;  %v3060_v40 = vld [vmem:[%s3170_s23] ss:$0 sm:$0xff] }
 0x561   : > { %v1732_v17 = vsub.f32 1.0, %v1731_v42  ;;  %v902_v26 = vmul.f32 %v3060_v40, %v2847_v8 }
 0x562   : > { %v1586_v45 = vpack.c.bf16 %v1585_v27, %v1585_v27 }
 0x563   : > { %v1733_v48 = vmul.f32 %v2455_v5, %v1732_v17  ;;  %v903_v17 = vmul.f32 %v3060_v40, %v2885_v54 }
 0x565   : > { %v1734_v61 = vadd.f32 %v2455_v5, %v1733_v48 }
 0x567   : > { %v1738_v34 = vsel %vm1737_vm6, %v2455_v5, %v1734_v61 }
 0x568   : > { %v1743_v4 = vsel %vm1740_vm9, %v1742_v56, %v1738_v34  ;;  %v2475_v56 = vld [vmem:[%s3165_s11 + $0x8] sm:$0xff] }
 0x569   : > { %v1760_v46 = vmul.f32 %v1743_v4, %v1720_v50 }
 0x573   : > { %v1588_v19 = vpop.permute.xlu0 %1587 }
 0x574   : > { %v1593_v29 = vsel %vm1005_vm15, %v1588_v19, 0 }
 0x575   : > { %1602 = vmatpush.bf16.msrb.mxu3 %v1593_v29 }
 0x576   : > { %v1298_v13 = vpop.permute.xlu1 %1297 }
 0x577   : > { %v1308_v41 = vsel %vm937_vm0, %v3015_v36, %v1298_v13 }
 0x578   : > { %2261 = vmatmul.msk.bf16.vlgmr.msrb.gmra.mxu3 %vm908_vm3, %v1586_v45 }
 0x57b   : > { %v1302_v12 = vpop.permute.xlu0 %1301 }
 0x57c   : > { %v1310_v25 = vsel %vm1309_vm7, %v1308_v41, %v1302_v12 }
 0x583   : > { %v1306_v15 = vpop.permute.xlu0 %1305 }
 0x584   : > { %v1312_v11 = vsel %vm1311_vm8, %v1310_v25, %v1306_v15  ;;  %v2375_v15 = vld [vmem:[%s2614_s14 + $0x34] sm:$0xf0] }
 0x585   : > { %v1714_v57 = vadd.f32 %v1312_v11, %v902_v26  ;;  %v2307_v26 = vld [vmem:[%s2614_s14 + $0x30] sm:$0xf]  ;;  %v2374_v11 = vld [vmem:[%s2614_s14 + $0x34] sm:$0xf] }
 0x587   : > { %v3068_v28 = vmul.f32 %v1760_v46, %v1714_v57  ;;  %v2308_v46 = vor.u32 %v2375_v15, %v2307_v26  ;;  %v2309_v57 = vld [vmem:[%s2614_s14 + $0x38] sm:$0xf0] }
 0x589   : > { %1910 = vmatpush.bf16.msra.mxu3 %v2308_v46 }
 0x5a7   : > { %v1650_v37 = vpop.trf.xlu2 }
 0x5a8   : > { %v1666_v43 = vperm.slane %v1650_v37, 0  ;;  %v2299_v37 = vld [vmem:[%s2614_s14 + $0x20] sm:$0xf] }
 0x5a9   : > { %v1421_v38 = vpop.f32.mrf.mxu3 }
 0x5aa   : > { %v1671_v59 = vsub.f32 %v1666_v43, %v3036_v62  ;;  %v2373_v43 = vld [vmem:[%s2614_s14 + $0x24] sm:$0xf0] }
 0x5ac   : > { %v1672_v51 = vmin.f32 %v1671_v59, 0.0  ;;  %v2300_v59 = vor.u32 %v2373_v43, %v2299_v37 }
 0x5ae   : > { %v1673_v36 = vmul.f32 1.442695, %v1672_v51  ;;  %v2301_v51 = vld [vmem:[%s2614_s14 + $0x28] sm:$0xf0]  ;;  %1911 = vmatpush.bf16.msra.mxu3 %v2300_v59 }
 0x5b0   : > { %2456 = vpow2.f32 %v1673_v36 }
 0x5b1   : > { %v1423_v49 = vpop.f32.mrf.mxu3  ;;  %2458 = vpow2.f32 %v1726_v47 }
 0x5b6   : > { %v2457_v53 = vpop.eup %2456 }
 0x5b7   : > { %v1675_v8 = vmul.f32 %v2457_v53, %v2966_v44  ;;  %v2367_v44 = vld [vmem:[%s2608_s13 + $0x18] sm:$0xff]  ;;  %v2459_v50 = vpop.eup %2458  ;;  %v2291_v53 = vld [vmem:[%s2614_s14 + $0x10] sm:$0xf] }
 0x5b8   : > { %1804 = vmatpush.bf16.msrb.mxu2 %v2367_v44  ;;  %v1729_v24 = vadd.f32 1.0, %v2459_v50  ;;  %v2285_v44 = vld [vmem:[%s2614_s14 + $0x8] sm:$0xf0] }
 0x5b9   : > { %v1676_v6 = vmul.f32 %v1675_v8, %v3000_v14  ;;  %v2366_v14 = vld [vmem:[%s2608_s13 + $0x10] sm:$0xff]  ;;  %v2371_v8 = vld [vmem:[%s2614_s14 + $0x14] sm:$0xf0] }
 0x5ba   : > { %2460 = vrcp.f32 %v1729_v24  ;;  %v1756_v35 = vand.u32 2147483648, %v1729_v24  ;;  %vm1750_vm11 = vweird.f32 %v1729_v24  ;;  %v1754_v1 = vand.u32 2147483647, %v1729_v24 }
 0x5bb   : > { %v1677_v55 = vpack.c.bf16 %v1676_v6, %v1676_v6  ;;  %v2370_v6 = vld [vmem:[%s2614_s14 + $0x14] sm:$0xf] }
 0x5bc   : > { %1805 = vmatpush.bf16.msrb.mxu2 %v2366_v14  ;;  %v1757_v5 = vor.u32 1.1754944e-38, %v1756_v35  ;;  %vm1755_vm13 = vcmp.eq.f32.partialorder %v1754_v1, 8.507059e+37 }
 0x5bd   : > { %2263 = vmatmul.msk.bf16.vlgmr.msra.gmra.mxu1 %vm908_vm3, %v1677_v55 }
 0x5c0   : > { %1806 = vmatpush.bf16.msrb.mxu2 %v2365_v18  ;;  %v2461_v58 = vpop.eup %2460 }
 0x5c1   : > { %v1746_v0 = vmul.f32 %v2461_v58, %v1729_v24  ;;  %vm1751_vm10 = vweird.f32 %v2461_v58 }
 0x5c2   : > { %vm1752_vm12 = vmor %vm1750_vm11, %vm1751_vm10 }
 0x5c3   : > { %v1747_v23 = vsub.f32 1.0, %v1746_v0 }
 0x5c4   : > { %1807 = vmatpush.bf16.msrb.mxu2 %v2364_v52 }
 0x5c5   : > { %v1748_v3 = vmul.f32 %v2461_v58, %v1747_v23 }
 0x5c7   : > { %v1749_v33 = vadd.f32 %v2461_v58, %v1748_v3 }
 0x5c9   : > { %v1753_v31 = vsel %vm1752_vm12, %v2461_v58, %v1749_v33 }
 0x5ca   : > { %v1513_v60 = vpop.f32.mrf.mxu1  ;;  %v1758_v42 = vsel %vm1755_vm13, %v1757_v5, %v1753_v31  ;;  %v2423_v5 = vld [vmem:[%s3171_s12] ss:$0 sm:$0xff] }
 0x5cb   : > { %1700 = vrot.lane.b32.xlu2 %v1513_v60, %s2487_s29  ;;  %v1761_v45 = vmul.f32 %v1758_v42, %v1721_v22  ;;  %v2292_v60 = vor.u32 %v2371_v8, %v2291_v53 }
 0x5cd   : > { %1912 = vmatpush.bf16.msra.mxu3 %v2292_v60 }
 0x5d2   : > { %v1515_v63 = vpop.f32.mrf.mxu1 }
 0x5d3   : > { %v2293_v63 = vld [vmem:[%s2614_s14 + $0x18] sm:$0xf0] }
 0x5fb   : > { %v1604_v62 = vpop.f32.mrf.mxu3 }
 0x5fc   : > { %1704 = vrot.lane.b32.xlu0 %v1604_v62, %s2489_s27  ;;  %v2283_v62 = vld [vmem:[%s2614_s14] sm:$0xf] }
 0x603   : > { %v1606_v2 = vpop.f32.mrf.mxu3 }
 0x604   : > { %v2369_v2 = vld [vmem:[%s2614_s14 + $0x4] sm:$0xf0] }
 0x605   : > { %v2284_v18 = vor.u32 %v2369_v2, %v2283_v62 }
 0x607   : > { %1913 = vmatpush.bf16.msra.mxu3 %v2284_v18 }
 0x625   : > { %v1701_v10 = vpop.permute.xlu2 %1700 }
 0x626   : > { %v1711_v7 = vsel %vm937_vm0, %v1421_v38, %v1701_v10  ;;  %v2372_v38 = vld [vmem:[%s2614_s14 + $0x24] sm:$0xf] }
 0x627   : > { %v2304_v36 = vor.u32 %v2372_v38, %v2301_v51 }
 0x63a   : > { %v1695_v21 = vpop.f32.mrf.mxu1 }
 0x63b   : > { %1708 = vrot.lane.b32.xlu0 %v1695_v21, %s2491_s26  ;;  %v2296_v21 = vor.u32 %v2370_v6, %v2293_v63 }
 0x642   : > { %v1697_v20 = vpop.f32.mrf.mxu1 }
 0x643   : > { %v2368_v20 = vld [vmem:[%s2614_s14 + $0x4] sm:$0xf] }
 0x644   : > { %v2288_v22 = vor.u32 %v2368_v20, %v2285_v44 }
 0x66e   : > { %v1705_v30 = vpop.permute.xlu0 %1704 }
 0x66f   : > { %v1712_v27 = vsel %vm1309_vm7, %v1711_v7, %v1705_v30 }
 0x6ad   : > { %v1709_v19 = vpop.permute.xlu0 %1708 }
 0x6ae   : > { %v1713_v29 = vsel %vm1311_vm8, %v1712_v27, %v1709_v19 }
 0x6af   : > { %v1715_v48 = vadd.f32 %v1713_v29, %v903_v17 }
 0x6b1   : > { %v1763_v12 = vmul.f32 %v1761_v45, %v1715_v48  ;;  %v2383_v45 = vld [vmem:[%s2619_s30 + $0x38] sm:$0xff]  ;;  %v2382_v48 = vld [vmem:[%s2619_s30 + $0x30] sm:$0xff] }
 0x6b2   : > { %2041 = vmatpush.bf16.msrb.mxu1 %v2383_v45 }
 0x6b3   : > { %v1764_v61 = vpack.c.bf16 %v1763_v12, %v3068_v28  ;;  %v2312_v28 = vor.u32 %v2374_v11, %v2309_v57  ;;  %v2381_v12 = vld [vmem:[%s2619_s30 + $0x28] sm:$0xff]  ;;  %v2376_v11 = vld [vmem:[%s2619_s30] sm:$0xff] }
 0x6b5   : > { %2280 = vmatmul.msk.bf16.vlgmr.msrb.gmra.mxu2 %vm539_vm1, %v1764_v61  ;;  %1924 = vmatpush.bf16.msrb.mxu0 %v2312_v28  ;;  %v2380_v61 = vld [vmem:[%s2619_s30 + $0x20] sm:$0xff] }
 0x6b6   : > { %2042 = vmatpush.bf16.msrb.mxu1 %v2382_v48 }
 0x6b9   : > { %1925 = vmatpush.bf16.msrb.mxu0 %v2304_v36 }
 0x6ba   : > { %2043 = vmatpush.bf16.msrb.mxu1 %v2381_v12 }
 0x6bd   : > { %1926 = vmatpush.bf16.msrb.mxu0 %v2296_v21 }
 0x6be   : > { %2044 = vmatpush.bf16.msrb.mxu1 %v2380_v61 }
 0x6c1   : > { %1927 = vmatpush.bf16.msrb.mxu0 %v2288_v22 }
 0x738   : > { %v1809_v16 = vpop.f32.mrf.mxu2 }
 0x739   : > { %v3093_v13 = vadd.f32 %v2474_v9, %v1809_v16 }
 0x73b   : > { %v1814_v54 = vmul.f32 %v3093_v13, %v3093_v13 }
 0x73d   : > { %v1816_v40 = vsel %vm539_vm1, %v1814_v54, 0.0  ;;  %v2379_v54 = vld [vmem:[%s2619_s30 + $0x18] sm:$0xff] }
 0x73e   : > { %1817 = vadd.xlane.f32.xlu0 %v1816_v40  ;;  %2045 = vmatpush.bf16.msrb.mxu1 %v2379_v54 }
 0x740   : > { %v1811_v34 = vpop.f32.mrf.mxu2 }
 0x741   : > { %v3101_v41 = vadd.f32 %v2475_v56, %v1811_v34  ;;  %v2378_v34 = vld [vmem:[%s2619_s30 + $0x10] sm:$0xff] }
 0x742   : > { %2046 = vmatpush.bf16.msrb.mxu1 %v2378_v34 }
 0x743   : > { %v1815_v4 = vmul.f32 %v3101_v41, %v3101_v41 }
 0x745   : > { %v1819_v25 = vsel %vm539_vm1, %v1815_v4, 0.0 }
 0x746   : > { %1820 = vadd.xlane.f32.xlu1 %v1819_v25  ;;  %v2377_v25 = vld [vmem:[%s2619_s30 + $0x8] sm:$0xff] }
 0x747   : > { %2047 = vmatpush.bf16.msrb.mxu1 %v2377_v25 }
 0x74b   : > { %2048 = vmatpush.bf16.msrb.mxu1 %v2376_v11 }
 0x7b1   : > { %v1818_v49 = vpop.xlane.xlu0 %1817 }
 0x7b2   : > { %v1822_v55 = vmul.f32 %v1818_v49, %v2661_v32 }
 0x7b4   : > { %v1824_v14 = vadd.f32 1e-05, %v1822_v55 }
 0x7b6   : > { %2462 = vrsqrt.f32 %v1824_v14  ;;  %vm1832_vm15 = vweird.f32 %v1824_v14 }
 0x7b9   : > { %v1821_v39 = vpop.xlane.xlu1 %1820 }
 0x7ba   : > { %v1823_v47 = vmul.f32 %v1821_v39, %v2661_v32 }
 0x7bc   : > { %v2463_v50 = vpop.eup %2462  ;;  %v1825_v24 = vadd.f32 1e-05, %v1823_v47 }
 0x7bd   : > { %v1827_v52 = vmul.f32 %v2463_v50, %v1824_v14  ;;  %vm1833_vm14 = vweird.f32 %v2463_v50 }
 0x7be   : > { %2464 = vrsqrt.f32 %v1825_v24  ;;  %vm1834_vm0 = vmor %vm1832_vm15, %vm1833_vm14  ;;  %vm1842_vm3 = vweird.f32 %v1825_v24 }
 0x7bf   : > { %v1828_v58 = vmul.f32 %v2463_v50, %v1827_v52 }
 0x7c1   : > { %v1829_v0 = vmul.f32 0.5, %v1828_v58 }
 0x7c3   : > { %v1830_v23 = vsub.f32 1.5, %v1829_v0 }
 0x7c4   : > { %v2465_v3 = vpop.eup %2464 }
 0x7c5   : > { %v1837_v30 = vmul.f32 %v2465_v3, %v1825_v24  ;;  %v1831_v33 = vmul.f32 %v2463_v50, %v1830_v23  ;;  %vm1843_vm2 = vweird.f32 %v2465_v3 }
 0x7c6   : > { %vm1844_vm4 = vmor %vm1842_vm3, %vm1843_vm2 }
 0x7c7   : > { %v1838_v35 = vmul.f32 %v2465_v3, %v1837_v30  ;;  %v1835_v10 = vsel %vm1834_vm0, %v2463_v50, %v1831_v33 }
 0x7c8   : > { %v1846_v7 = vmul.f32 %v1835_v10, %v3093_v13 }
 0x7c9   : > { %v1839_v1 = vmul.f32 0.5, %v1838_v35 }
 0x7ca   : > { %v1852_v19 = vmul.f32 %v2423_v5, %v1846_v7 }
 0x7cb   : > { %v1840_v31 = vsub.f32 1.5, %v1839_v1 }
 0x7cd   : > { %v1841_v32 = vmul.f32 %v2465_v3, %v1840_v31 }
 0x7cf   : > { %v1845_v42 = vsel %vm1844_vm4, %v2465_v3, %v1841_v32 }
 0x7d0   : > { %v1847_v27 = vmul.f32 %v1845_v42, %v3101_v41 }
 0x7d2   : > { %v1853_v17 = vmul.f32 %v2423_v5, %v1847_v27 }
 0x7d4   : > { %v1854_v29 = vpack.c.bf16 %v1853_v17, %v1852_v19 }
 0x7d6   : > { %2313 = vmatmul.msk.bf16.vlgmr.msra.gmra.mxu3 %vm539_vm1, %v1854_v29  ;;  %2314 = vmatmul.msk.bf16.vlgmr.msrb.gmra.mxu0 %vm539_vm1, %v1854_v29 }
 0x853   : > { %v1929_v6 = vpop.f32.mrf.mxu0 }
 0x859   : > { %v1915_v16 = vpop.f32.mrf.mxu3 }
 0x85a   : > { %v1934_v9 = vsub.f32 0.0, %v1915_v16 }
 0x85b   : > { %v1931_v50 = vpop.f32.mrf.mxu0 }
 0x85c   : > { %v1936_v40 = vmul.f32 1.442695, %v1934_v9 }
 0x85e   : > { %2466 = vpow2.f32 %v1936_v40 }
 0x861   : > { %v1917_v56 = vpop.f32.mrf.mxu3 }
 0x862   : > { %v1935_v4 = vsub.f32 0.0, %v1917_v56 }
 0x864   : > { %v2467_v26 = vpop.eup %2466  ;;  %v1938_v15 = vmul.f32 1.442695, %v1935_v4 }
 0x865   : > { %v1940_v46 = vadd.f32 1.0, %v2467_v26 }
 0x866   : > { %2468 = vpow2.f32 %v1938_v15 }
 0x867   : > { %2470 = vrcp.f32 %v1940_v46  ;;  %v1953_v49 = vand.u32 2147483648, %v1940_v46  ;;  %vm1947_vm6 = vweird.f32 %v1940_v46  ;;  %v1951_v53 = vand.u32 2147483647, %v1940_v46 }
 0x869   : > { %v1954_v63 = vor.u32 1.1754944e-38, %v1953_v49  ;;  %vm1952_vm8 = vcmp.eq.f32.partialorder %v1951_v53, 8.507059e+37 }
 0x86c   : > { %v2469_v57 = vpop.eup %2468 }
 0x86d   : > { %v2471_v28 = vpop.eup %2470  ;;  %v1941_v37 = vadd.f32 1.0, %v2469_v57 }
 0x86e   : > { %v1943_v43 = vmul.f32 %v2471_v28, %v1940_v46  ;;  %vm1948_vm5 = vweird.f32 %v2471_v28 }
 0x86f   : > { %2472 = vrcp.f32 %v1941_v37  ;;  %vm1949_vm7 = vmor %vm1947_vm6, %vm1948_vm5  ;;  %v1968_v62 = vand.u32 2147483648, %v1941_v37  ;;  %v1966_v21 = vand.u32 2147483647, %v1941_v37  ;;  %vm1962_vm10 = vweird.f32 %v1941_v37 }
 0x870   : > { %v1944_v38 = vsub.f32 1.0, %v1943_v43 }
 0x871   : > { %v1969_v14 = vor.u32 1.1754944e-38, %v1968_v62  ;;  %vm1967_vm12 = vcmp.eq.f32.partialorder %v1966_v21, 8.507059e+37 }
 0x872   : > { %v1945_v59 = vmul.f32 %v2471_v28, %v1944_v38 }
 0x874   : > { %v1946_v51 = vadd.f32 %v2471_v28, %v1945_v59 }
 0x875   : > { %v2473_v36 = vpop.eup %2472 }
 0x876   : > { %v1958_v8 = vmul.f32 %v2473_v36, %v1941_v37  ;;  %v1950_v55 = vsel %vm1949_vm7, %v2471_v28, %v1946_v51  ;;  %vm1963_vm9 = vweird.f32 %v2473_v36 }
 0x877   : > { %v1955_v20 = vsel %vm1952_vm8, %v1954_v63, %v1950_v55  ;;  %vm1964_vm11 = vmor %vm1962_vm10, %vm1963_vm9 }
 0x878   : > { %v1959_v60 = vsub.f32 1.0, %v1958_v8  ;;  %v1972_v18 = vmul.f32 %v1955_v20, %v1915_v16 }
 0x87a   : > { %v1960_v2 = vmul.f32 %v2473_v36, %v1959_v60  ;;  %v1974_v24 = vmul.f32 %v1972_v18, %v1929_v6 }
 0x87c   : > { %v1961_v44 = vadd.f32 %v2473_v36, %v1960_v2 }
 0x87e   : > { %v1965_v22 = vsel %vm1964_vm11, %v2473_v36, %v1961_v44 }
 0x87f   : > { %v1970_v39 = vsel %vm1967_vm12, %v1969_v14, %v1965_v22 }
 0x880   : > { %v1973_v47 = vmul.f32 %v1970_v39, %v1917_v56 }
 0x882   : > { %v1975_v52 = vmul.f32 %v1973_v47, %v1931_v50 }
 0x884   : > { %v1976_v58 = vpack.c.bf16 %v1975_v52, %v1974_v24 }
 0x886   : > { %2049 = vmatmul.bf16.vlgmr.msrb.gmra.mxu1 %v1976_v58 }
 0x903   : > { %v2050_v0 = vpop.f32.mrf.mxu1 }
 0x904   : > { %v2051_v23 = vadd.f32 %v2050_v0, %v3093_v13 }
 0x906   : > { %2055 = vst.msk [vmem:[%s3165_s11] sm:$0xff] %vm539_vm1, %v2051_v23 }
 0x90b   : > { %v2052_v3 = vpop.f32.mrf.mxu1 }
 0x90c   : > { %v2053_v30 = vadd.f32 %v2052_v3, %v3101_v41 }
 0x90e   : > { %2056 = vst.msk [vmem:[%s3165_s11 + $0x8] sm:$0xff] %vm539_vm1, %v2053_v30 }
 0x90f PF: > { %s3172_s18 = sld [smem:[#allocation2_spill]] }
 0x915   : > { %s21_s17 = sadd.s32 1, %s3172_s18  }
 0x916   : > { %p18_p5 = scmp.ge.s32.totalorder %s21_s17, 4  }
 0x918   :  { %20 = sbr.rel (!%p18_p5) target bundleno = 1 (0x1), region = 121 }

</bundles_post_ra>
